<compile_context>
chip_gen: v7x
topology: tpu7x:2x2x1
jax: 0.10.0
libtpu: 0.0.40
codegen_flags: <defaults>
</compile_context>

<pallas_src>
import math
import functools

import jax
import jax.numpy as jnp
from jax import lax
from jax.experimental import pallas as pl
from jax.experimental.pallas import tpu as pltpu


def _round_up(x, m):
    return (x + m - 1) // m * m


def _cross_attention_kernel(x_ref, y_ref,
                            wq_ref, bq_ref,
                            wk_ref, bk_ref,
                            wv_ref, bv_ref,
                            wo_ref, bo_ref,
                            o_ref,
                            attn_ref,
                            *, n_heads, d_head, lkv):
    # x_ref: (TQ, D), y_ref: (LKV_PAD, Dc) -- batch dim squeezed by BlockSpec.
    # Weights are pre-transposed to (in_dim, out_dim); scale folded into Wq/bq.
    compute_dtype = x_ref.dtype

    x = x_ref[...]
    y = y_ref[...]

    # Q/K/V projections: plain `inp @ W` on the MXU, f32 accumulation.
    q = jnp.dot(x, wq_ref[...], preferred_element_type=jnp.float32) + bq_ref[...]
    k = jnp.dot(y, wk_ref[...], preferred_element_type=jnp.float32) + bk_ref[...]
    v = jnp.dot(y, wv_ref[...], preferred_element_type=jnp.float32) + bv_ref[...]

    # Keep the attention-matmul operands in the (narrow) compute dtype.
    qc = q.astype(compute_dtype)
    kc = k.astype(compute_dtype)
    vc = v.astype(compute_dtype)

    lkv_pad = y.shape[0]
    if lkv_pad != lkv:
        # Additive -inf bias on padded KV columns; hoisted out of the head loop.
        col = lax.broadcasted_iota(jnp.int32, (1, lkv_pad), 1)
        kv_bias = jnp.where(col < lkv, 0.0, -jnp.inf).astype(jnp.float32)
    else:
        kv_bias = None

    # Static unroll over heads; each head writes its (TQ, d_head) output directly
    # into the (TQ, D) scratch slab -- no jnp.concatenate, no long-lived buffers.
    for h in range(n_heads):
        lo = h * d_head
        qh = qc[:, lo:lo + d_head]      # (TQ, dh)
        kh = kc[:, lo:lo + d_head]      # (LKV_PAD, dh)
        vh = vc[:, lo:lo + d_head]      # (LKV_PAD, dh)

        # q @ k^T via dot_general "NT" form (MXU handles it natively).
        s = lax.dot_general(qh, kh, (((1,), (1,)), ((), ())),
                            preferred_element_type=jnp.float32)  # (TQ, LKV_PAD)
        if kv_bias is not None:
            s = s + kv_bias

        # Softmax in f32 (scale already folded into Wq/bq by the wrapper).
        m = jnp.max(s, axis=-1, keepdims=True)
        p = jnp.exp(s - m)
        l = jnp.sum(p, axis=-1, keepdims=True)
        p = p * pl.reciprocal(l)        # reciprocal+mul instead of per-elem divide
        # (approx=True would push this to the EUP; kept exact for f32 tolerance.)

        head = jnp.dot(p.astype(compute_dtype), vh,
                       preferred_element_type=jnp.float32)       # (TQ, dh)
        attn_ref[:, lo:lo + d_head] = head.astype(compute_dtype)

    # One deep output projection over the full D contraction.
    out = jnp.dot(attn_ref[...], wo_ref[...],
                  preferred_element_type=jnp.float32) + bo_ref[...]
    o_ref[...] = out.astype(o_ref.dtype)


def cross_attention(x, y, params, n_heads, *, tq=None):
    """x: (B, Lq, d_embed), y: (B, Lkv, d_cross) -> (B, Lq, d_embed)."""
    B, Lq, D = x.shape
    _, Lkv, Dc = y.shape
    assert D % n_heads == 0, "d_embed must be divisible by n_heads"
    d_head = D // n_heads

    wq, bq, wk, bk, wv, bv, wo, bo = params

    # Fold the 1/sqrt(d_head) softmax scale into the Q projection (free at runtime).
    scale = 1.0 / math.sqrt(d_head)
    wq = wq * scale
    bq = bq * scale

    # Pre-transpose once: PyTorch Linear stores (out, in); the kernel wants (in, out)
    # so it never transposes a weight tile in VMEM.
    wq_t, wk_t, wv_t, wo_t = wq.T, wk.T, wv.T, wo.T

    # Pad Lkv to a lane-dense multiple of 128 (masked with -inf inside the kernel).
    lkv_pad = max(128, _round_up(Lkv, 128))
    if lkv_pad != Lkv:
        y = jnp.pad(y, ((0, 0), (0, lkv_pad - Lkv), (0, 0)))

    # Lq tiling: bounds the live activation slab (mandatory for SD shapes on
    # v7x's 64 MiB VMEM) and gives the pipeline many steps to overlap DMA.
    if tq is None:
        tq = min(512, _round_up(Lq, 8))       # multiple of 8 sublanes
    lq_pad = _round_up(Lq, tq)
    if lq_pad != Lq:
        x = jnp.pad(x, ((0, 0), (0, lq_pad - Lq), (0, 0)))

    kernel = functools.partial(_cross_attention_kernel,
                               n_heads=n_heads, d_head=d_head, lkv=Lkv)

    const2d = lambda shape: pl.BlockSpec(shape, lambda b, qi: (0, 0))

    out = pl.pallas_call(
        kernel,
        out_shape=jax.ShapeDtypeStruct((B, lq_pad, D), x.dtype),
        grid_spec=pltpu.PrefetchScalarGridSpec(
            num_scalar_prefetch=0,
            grid=(B, lq_pad // tq),
            in_specs=[
                pl.BlockSpec((None, tq, D), lambda b, qi: (b, qi, 0)),       # x tile
                pl.BlockSpec((None, lkv_pad, Dc), lambda b, qi: (b, 0, 0)),  # y (whole; Lkv small)
                const2d((D, D)),    # Wq^T (scale folded in)
                const2d((1, D)),    # bq  (scale folded in)
                const2d((Dc, D)),   # Wk^T
                const2d((1, D)),    # bk
                const2d((Dc, D)),   # Wv^T
                const2d((1, D)),    # bv
                const2d((D, D)),    # Wo^T
                const2d((1, D)),    # bo
            ],
            out_specs=pl.BlockSpec((None, tq, D), lambda b, qi: (b, qi, 0)),
            scratch_shapes=[pltpu.VMEM((tq, D), x.dtype)],   # per-tile head slab
        ),
        compiler_params=pltpu.CompilerParams(
            # Both axes independent -> megacore / 2-TC chips can split the grid.
            dimension_semantics=("parallel", "parallel"),
            # Raise the scoped-VMEM ceiling above the 16/32 MiB defaults; 64 MiB
            # is safe on every listed generation (v7x physical cap).
            vmem_limit_bytes=64 * 1024 * 1024,
        ),
    )(x, y, wq_t, bq, wk_t, bk, wv_t, bv, wo_t, bo)

    return out[:, :Lq, :]


def init_params(key, d_embed, d_cross):
    """Deterministic synthetic weights (PyTorch-Linear-like uniform init)."""
    ks = jax.random.split(key, 8)

    def lin(kw, kb, out_dim, in_dim):
        bound = 1.0 / math.sqrt(in_dim)
        w = jax.random.uniform(kw, (out_dim, in_dim), jnp.float32, -bound, bound)
        b = jax.random.uniform(kb, (1, out_dim), jnp.float32, -bound, bound)
        return w, b

    wq, bq = lin(ks[0], ks[1], d_embed, d_embed)
    wk, bk = lin(ks[2], ks[3], d_embed, d_cross)
    wv, bv = lin(ks[4], ks[5], d_embed, d_cross)
    wo, bo = lin(ks[6], ks[7], d_embed, d_embed)
    return (wq, bq, wk, bk, wv, bv, wo, bo)


def cross_attention_ref(x, y, params, n_heads):
    """Pure-JAX reference mirroring the PyTorch forward."""
    wq, bq, wk, bk, wv, bv, wo, bo = params
    B, Lq, D = x.shape
    d_head = D // n_heads
    q = x @ wq.T + bq
    k = y @ wk.T + bk
    v = y @ wv.T + bv
    q = q.reshape(B, Lq, n_heads, d_head).transpose(0, 2, 1, 3)
    k = k.reshape(B, -1, n_heads, d_head).transpose(0, 2, 1, 3)
    v = v.reshape(B, -1, n_heads, d_head).transpose(0, 2, 1, 3)
    w = (q @ k.transpose(0, 1, 3, 2)) / math.sqrt(d_head)
    w = jax.nn.softmax(w, axis=-1)
    o = (w @ v).transpose(0, 2, 1, 3).reshape(B, Lq, D)
    return o @ wo.T + bo


if __name__ == "__main__":
    B, Lq, Lkv = 2, 16, 8
    d_embed, d_cross, n_heads = 32, 16, 4

    key = jax.random.PRNGKey(0)
    kx, ky, kp = jax.random.split(key, 3)
    x = jax.random.normal(kx, (B, Lq, d_embed), jnp.float32)
    y = jax.random.normal(ky, (B, Lkv, d_cross), jnp.float32)
    params = init_params(kp, d_embed, d_cross)

    out = cross_attention(x, y, params, n_heads)
    out = jax.block_until_ready(out)

    ref = cross_attention_ref(x, y, params, n_heads)
    assert out.shape == (B, Lq, d_embed)
    assert jnp.allclose(out, ref, atol=2e-4, rtol=2e-4), "mismatch vs reference"

    print("KERNEL_OK")
</pallas_src>

<mosaic_0001>
module attributes {stable_mosaic.version = 11 : i64} {
  func.func @_cross_attention_kernel(%arg0: i32, %arg1: i32, %arg2: memref<1x16x32xf32, #tpu.memory_space<vmem>>, %arg3: memref<1x128x16xf32, #tpu.memory_space<vmem>>, %arg4: memref<32x32xf32, #tpu.memory_space<vmem>>, %arg5: memref<1x32xf32, #tpu.memory_space<vmem>>, %arg6: memref<16x32xf32, #tpu.memory_space<vmem>>, %arg7: memref<1x32xf32, #tpu.memory_space<vmem>>, %arg8: memref<16x32xf32, #tpu.memory_space<vmem>>, %arg9: memref<1x32xf32, #tpu.memory_space<vmem>>, %arg10: memref<32x32xf32, #tpu.memory_space<vmem>>, %arg11: memref<1x32xf32, #tpu.memory_space<vmem>>, %arg12: memref<1x16x32xf32, #tpu.memory_space<vmem>>, %arg13: memref<16x32xf32, #tpu.memory_space<vmem>>) attributes {dimension_semantics = [#tpu.dimension_semantics<parallel>, #tpu.dimension_semantics<parallel>], iteration_bounds = array<i64: 2, 1>, scalar_prefetch = 0 : i64, scratch_operands = 1 : i64, tpu.core_type = #tpu.core_type<tc>, window_params = [{transform_indices = @transform_0, window_bounds = array<i64: 1, 16, 32>}, {transform_indices = @transform_1, window_bounds = array<i64: 1, 128, 16>}, {pipeline_mode = #tpu.pipeline_mode<synchronous>, transform_indices = @transform_2, window_bounds = array<i64: 32, 32>}, {pipeline_mode = #tpu.pipeline_mode<synchronous>, transform_indices = @transform_3, window_bounds = array<i64: 1, 32>}, {pipeline_mode = #tpu.pipeline_mode<synchronous>, transform_indices = @transform_4, window_bounds = array<i64: 16, 32>}, {pipeline_mode = #tpu.pipeline_mode<synchronous>, transform_indices = @transform_5, window_bounds = array<i64: 1, 32>}, {pipeline_mode = #tpu.pipeline_mode<synchronous>, transform_indices = @transform_6, window_bounds = array<i64: 16, 32>}, {pipeline_mode = #tpu.pipeline_mode<synchronous>, transform_indices = @transform_7, window_bounds = array<i64: 1, 32>}, {pipeline_mode = #tpu.pipeline_mode<synchronous>, transform_indices = @transform_8, window_bounds = array<i64: 32, 32>}, {pipeline_mode = #tpu.pipeline_mode<synchronous>, transform_indices = @transform_9, window_bounds = array<i64: 1, 32>}, {transform_indices = @transform_10, window_bounds = array<i64: 1, 16, 32>}]} {
    %c0 = arith.constant 0 : index
    %c0_0 = arith.constant 0 : index
    %c0_1 = arith.constant 0 : index
    %0 = vector.load %arg2[%c0, %c0_0, %c0_1] : memref<1x16x32xf32, #tpu.memory_space<vmem>>, vector<1x16x32xf32>
    %1 = vector.shape_cast %0 : vector<1x16x32xf32> to vector<16x32xf32>
    %c0_2 = arith.constant 0 : index
    %c0_3 = arith.constant 0 : index
    %c0_4 = arith.constant 0 : index
    %2 = vector.load %arg3[%c0_2, %c0_3, %c0_4] : memref<1x128x16xf32, #tpu.memory_space<vmem>>, vector<1x128x16xf32>
    %3 = vector.shape_cast %2 : vector<1x128x16xf32> to vector<128x16xf32>
    %c0_5 = arith.constant 0 : index
    %c0_6 = arith.constant 0 : index
    %4 = vector.load %arg4[%c0_5, %c0_6] : memref<32x32xf32, #tpu.memory_space<vmem>>, vector<32x32xf32>
    %cst = arith.constant dense<0.000000e+00> : vector<16x32xf32>
    %5 = tpu.matmul %1, %4, %cst {dimension_numbers = #tpu.dot_dimension_numbers<[1], [0], [0], [1], [0, 0, 1, 1], [], []>} : vector<16x32xf32>, vector<32x32xf32>, vector<16x32xf32> -> vector<16x32xf32>
    %c0_7 = arith.constant 0 : index
    %c0_8 = arith.constant 0 : index
    %6 = vector.load %arg5[%c0_7, %c0_8] : memref<1x32xf32, #tpu.memory_space<vmem>>, vector<1x32xf32>
    %7 = vector.broadcast %6 : vector<1x32xf32> to vector<16x32xf32>
    %8 = arith.addf %5, %7 : vector<16x32xf32>
    %c0_9 = arith.constant 0 : index
    %c0_10 = arith.constant 0 : index
    %9 = vector.load %arg6[%c0_9, %c0_10] : memref<16x32xf32, #tpu.memory_space<vmem>>, vector<16x32xf32>
    %cst_11 = arith.constant dense<0.000000e+00> : vector<128x32xf32>
    %10 = tpu.matmul %3, %9, %cst_11 {dimension_numbers = #tpu.dot_dimension_numbers<[1], [0], [0], [1], [0, 0, 1, 1], [], []>} : vector<128x16xf32>, vector<16x32xf32>, vector<128x32xf32> -> vector<128x32xf32>
    %c0_12 = arith.constant 0 : index
    %c0_13 = arith.constant 0 : index
    %11 = vector.load %arg7[%c0_12, %c0_13] : memref<1x32xf32, #tpu.memory_space<vmem>>, vector<1x32xf32>
    %12 = vector.broadcast %11 : vector<1x32xf32> to vector<128x32xf32>
    %13 = arith.addf %10, %12 : vector<128x32xf32>
    %c0_14 = arith.constant 0 : index
    %c0_15 = arith.constant 0 : index
    %14 = vector.load %arg8[%c0_14, %c0_15] : memref<16x32xf32, #tpu.memory_space<vmem>>, vector<16x32xf32>
    %cst_16 = arith.constant dense<0.000000e+00> : vector<128x32xf32>
    %15 = tpu.matmul %3, %14, %cst_16 {dimension_numbers = #tpu.dot_dimension_numbers<[1], [0], [0], [1], [0, 0, 1, 1], [], []>} : vector<128x16xf32>, vector<16x32xf32>, vector<128x32xf32> -> vector<128x32xf32>
    %c0_17 = arith.constant 0 : index
    %c0_18 = arith.constant 0 : index
    %16 = vector.load %arg9[%c0_17, %c0_18] : memref<1x32xf32, #tpu.memory_space<vmem>>, vector<1x32xf32>
    %17 = vector.broadcast %16 : vector<1x32xf32> to vector<128x32xf32>
    %18 = arith.addf %15, %17 : vector<128x32xf32>
    %19 = tpu.iota {dimensions = array<i32: 1>} : vector<1x128xi32>
    %c8_i32 = arith.constant 8 : i32
    %20 = vector.broadcast %c8_i32 : i32 to vector<1x128xi32>
    %21 = arith.cmpi slt, %19, %20 : vector<1x128xi32>
    %cst_19 = arith.constant 0.000000e+00 : f32
    %cst_20 = arith.constant 0xFF800000 : f32
    %22 = vector.broadcast %cst_19 : f32 to vector<1x128xf32>
    %23 = vector.broadcast %cst_20 : f32 to vector<1x128xf32>
    %24 = arith.select %21, %22, %23 : vector<1x128xi1>, vector<1x128xf32>
    %25 = vector.extract_strided_slice %8 {offsets = [0, 0], sizes = [16, 8], strides = [1, 1]} : vector<16x32xf32> to vector<16x8xf32>
    %26 = vector.extract_strided_slice %13 {offsets = [0, 0], sizes = [128, 8], strides = [1, 1]} : vector<128x32xf32> to vector<128x8xf32>
    %27 = vector.extract_strided_slice %18 {offsets = [0, 0], sizes = [128, 8], strides = [1, 1]} : vector<128x32xf32> to vector<128x8xf32>
    %cst_21 = arith.constant dense<0.000000e+00> : vector<16x128xf32>
    %28 = tpu.matmul %25, %26, %cst_21 {dimension_numbers = #tpu.dot_dimension_numbers<[1], [1], [0], [0], [0, 0, 1, 0], [], []>} : vector<16x8xf32>, vector<128x8xf32>, vector<16x128xf32> -> vector<16x128xf32>
    %29 = vector.broadcast %24 : vector<1x128xf32> to vector<16x128xf32>
    %30 = arith.addf %28, %29 : vector<16x128xf32>
    %cst_22 = arith.constant dense<0xFF800000> : vector<16xf32>
    %31 = vector.multi_reduction <maximumf>, %30, %cst_22 [1] : vector<16x128xf32> to vector<16xf32>
    %32 = vector.shape_cast %31 : vector<16xf32> to vector<16x1xf32>
    %33 = vector.broadcast %32 : vector<16x1xf32> to vector<16x128xf32>
    %34 = arith.subf %30, %33 : vector<16x128xf32>
    %35 = math.exp %34 : vector<16x128xf32>
    %cst_23 = arith.constant dense<0.000000e+00> : vector<16xf32>
    %36 = vector.multi_reduction <add>, %35, %cst_23 [1] : vector<16x128xf32> to vector<16xf32>
    %37 = vector.shape_cast %36 : vector<16xf32> to vector<16x1xf32>
    %38 = tpu.reciprocal %37 : vector<16x1xf32> -> vector<16x1xf32>
    %39 = vector.broadcast %38 : vector<16x1xf32> to vector<16x128xf32>
    %40 = arith.mulf %35, %39 : vector<16x128xf32>
    %cst_24 = arith.constant dense<0.000000e+00> : vector<16x8xf32>
    %41 = tpu.matmul %40, %27, %cst_24 {dimension_numbers = #tpu.dot_dimension_numbers<[1], [0], [0], [1], [0, 0, 1, 1], [], []>} : vector<16x128xf32>, vector<128x8xf32>, vector<16x8xf32> -> vector<16x8xf32>
    %c0_25 = arith.constant 0 : index
    %c0_26 = arith.constant 0 : index
    %42 = vector.load %arg13[%c0_25, %c0_26] : memref<16x32xf32, #tpu.memory_space<vmem>>, vector<16x8xf32>
    tpu.vector_store %arg13[%c0_25, %c0_26], %41 {strides = array<i32>} : memref<16x32xf32, #tpu.memory_space<vmem>>, vector<16x8xf32>,
    %43 = vector.extract_strided_slice %8 {offsets = [0, 8], sizes = [16, 8], strides = [1, 1]} : vector<16x32xf32> to vector<16x8xf32>
    %44 = vector.extract_strided_slice %13 {offsets = [0, 8], sizes = [128, 8], strides = [1, 1]} : vector<128x32xf32> to vector<128x8xf32>
    %45 = vector.extract_strided_slice %18 {offsets = [0, 8], sizes = [128, 8], strides = [1, 1]} : vector<128x32xf32> to vector<128x8xf32>
    %cst_27 = arith.constant dense<0.000000e+00> : vector<16x128xf32>
    %46 = tpu.matmul %43, %44, %cst_27 {dimension_numbers = #tpu.dot_dimension_numbers<[1], [1], [0], [0], [0, 0, 1, 0], [], []>} : vector<16x8xf32>, vector<128x8xf32>, vector<16x128xf32> -> vector<16x128xf32>
    %47 = vector.broadcast %24 : vector<1x128xf32> to vector<16x128xf32>
    %48 = arith.addf %46, %47 : vector<16x128xf32>
    %cst_28 = arith.constant dense<0xFF800000> : vector<16xf32>
    %49 = vector.multi_reduction <maximumf>, %48, %cst_28 [1] : vector<16x128xf32> to vector<16xf32>
    %50 = vector.shape_cast %49 : vector<16xf32> to vector<16x1xf32>
    %51 = vector.broadcast %50 : vector<16x1xf32> to vector<16x128xf32>
    %52 = arith.subf %48, %51 : vector<16x128xf32>
    %53 = math.exp %52 : vector<16x128xf32>
    %cst_29 = arith.constant dense<0.000000e+00> : vector<16xf32>
    %54 = vector.multi_reduction <add>, %53, %cst_29 [1] : vector<16x128xf32> to vector<16xf32>
    %55 = vector.shape_cast %54 : vector<16xf32> to vector<16x1xf32>
    %56 = tpu.reciprocal %55 : vector<16x1xf32> -> vector<16x1xf32>
    %57 = vector.broadcast %56 : vector<16x1xf32> to vector<16x128xf32>
    %58 = arith.mulf %53, %57 : vector<16x128xf32>
    %cst_30 = arith.constant dense<0.000000e+00> : vector<16x8xf32>
    %59 = tpu.matmul %58, %45, %cst_30 {dimension_numbers = #tpu.dot_dimension_numbers<[1], [0], [0], [1], [0, 0, 1, 1], [], []>} : vector<16x128xf32>, vector<128x8xf32>, vector<16x8xf32> -> vector<16x8xf32>
    %c0_31 = arith.constant 0 : index
    %c8 = arith.constant 8 : index
    %60 = vector.load %arg13[%c0_31, %c8] : memref<16x32xf32, #tpu.memory_space<vmem>>, vector<16x8xf32>
    tpu.vector_store %arg13[%c0_31, %c8], %59 {strides = array<i32>} : memref<16x32xf32, #tpu.memory_space<vmem>>, vector<16x8xf32>,
    %61 = vector.extract_strided_slice %8 {offsets = [0, 16], sizes = [16, 8], strides = [1, 1]} : vector<16x32xf32> to vector<16x8xf32>
    %62 = vector.extract_strided_slice %13 {offsets = [0, 16], sizes = [128, 8], strides = [1, 1]} : vector<128x32xf32> to vector<128x8xf32>
    %63 = vector.extract_strided_slice %18 {offsets = [0, 16], sizes = [128, 8], strides = [1, 1]} : vector<128x32xf32> to vector<128x8xf32>
    %cst_32 = arith.constant dense<0.000000e+00> : vector<16x128xf32>
    %64 = tpu.matmul %61, %62, %cst_32 {dimension_numbers = #tpu.dot_dimension_numbers<[1], [1], [0], [0], [0, 0, 1, 0], [], []>} : vector<16x8xf32>, vector<128x8xf32>, vector<16x128xf32> -> vector<16x128xf32>
    %65 = vector.broadcast %24 : vector<1x128xf32> to vector<16x128xf32>
    %66 = arith.addf %64, %65 : vector<16x128xf32>
    %cst_33 = arith.constant dense<0xFF800000> : vector<16xf32>
    %67 = vector.multi_reduction <maximumf>, %66, %cst_33 [1] : vector<16x128xf32> to vector<16xf32>
    %68 = vector.shape_cast %67 : vector<16xf32> to vector<16x1xf32>
    %69 = vector.broadcast %68 : vector<16x1xf32> to vector<16x128xf32>
    %70 = arith.subf %66, %69 : vector<16x128xf32>
    %71 = math.exp %70 : vector<16x128xf32>
    %cst_34 = arith.constant dense<0.000000e+00> : vector<16xf32>
    %72 = vector.multi_reduction <add>, %71, %cst_34 [1] : vector<16x128xf32> to vector<16xf32>
    %73 = vector.shape_cast %72 : vector<16xf32> to vector<16x1xf32>
    %74 = tpu.reciprocal %73 : vector<16x1xf32> -> vector<16x1xf32>
    %75 = vector.broadcast %74 : vector<16x1xf32> to vector<16x128xf32>
    %76 = arith.mulf %71, %75 : vector<16x128xf32>
    %cst_35 = arith.constant dense<0.000000e+00> : vector<16x8xf32>
    %77 = tpu.matmul %76, %63, %cst_35 {dimension_numbers = #tpu.dot_dimension_numbers<[1], [0], [0], [1], [0, 0, 1, 1], [], []>} : vector<16x128xf32>, vector<128x8xf32>, vector<16x8xf32> -> vector<16x8xf32>
    %c0_36 = arith.constant 0 : index
    %c16 = arith.constant 16 : index
    %78 = vector.load %arg13[%c0_36, %c16] : memref<16x32xf32, #tpu.memory_space<vmem>>, vector<16x8xf32>
    tpu.vector_store %arg13[%c0_36, %c16], %77 {strides = array<i32>} : memref<16x32xf32, #tpu.memory_space<vmem>>, vector<16x8xf32>,
    %79 = vector.extract_strided_slice %8 {offsets = [0, 24], sizes = [16, 8], strides = [1, 1]} : vector<16x32xf32> to vector<16x8xf32>
    %80 = vector.extract_strided_slice %13 {offsets = [0, 24], sizes = [128, 8], strides = [1, 1]} : vector<128x32xf32> to vector<128x8xf32>
    %81 = vector.extract_strided_slice %18 {offsets = [0, 24], sizes = [128, 8], strides = [1, 1]} : vector<128x32xf32> to vector<128x8xf32>
    %cst_37 = arith.constant dense<0.000000e+00> : vector<16x128xf32>
    %82 = tpu.matmul %79, %80, %cst_37 {dimension_numbers = #tpu.dot_dimension_numbers<[1], [1], [0], [0], [0, 0, 1, 0], [], []>} : vector<16x8xf32>, vector<128x8xf32>, vector<16x128xf32> -> vector<16x128xf32>
    %83 = vector.broadcast %24 : vector<1x128xf32> to vector<16x128xf32>
    %84 = arith.addf %82, %83 : vector<16x128xf32>
    %cst_38 = arith.constant dense<0xFF800000> : vector<16xf32>
    %85 = vector.multi_reduction <maximumf>, %84, %cst_38 [1] : vector<16x128xf32> to vector<16xf32>
    %86 = vector.shape_cast %85 : vector<16xf32> to vector<16x1xf32>
    %87 = vector.broadcast %86 : vector<16x1xf32> to vector<16x128xf32>
    %88 = arith.subf %84, %87 : vector<16x128xf32>
    %89 = math.exp %88 : vector<16x128xf32>
    %cst_39 = arith.constant dense<0.000000e+00> : vector<16xf32>
    %90 = vector.multi_reduction <add>, %89, %cst_39 [1] : vector<16x128xf32> to vector<16xf32>
    %91 = vector.shape_cast %90 : vector<16xf32> to vector<16x1xf32>
    %92 = tpu.reciprocal %91 : vector<16x1xf32> -> vector<16x1xf32>
    %93 = vector.broadcast %92 : vector<16x1xf32> to vector<16x128xf32>
    %94 = arith.mulf %89, %93 : vector<16x128xf32>
    %cst_40 = arith.constant dense<0.000000e+00> : vector<16x8xf32>
    %95 = tpu.matmul %94, %81, %cst_40 {dimension_numbers = #tpu.dot_dimension_numbers<[1], [0], [0], [1], [0, 0, 1, 1], [], []>} : vector<16x128xf32>, vector<128x8xf32>, vector<16x8xf32> -> vector<16x8xf32>
    %c0_41 = arith.constant 0 : index
    %c24 = arith.constant 24 : index
    %96 = vector.load %arg13[%c0_41, %c24] : memref<16x32xf32, #tpu.memory_space<vmem>>, vector<16x8xf32>
    tpu.vector_store %arg13[%c0_41, %c24], %95 {strides = array<i32>} : memref<16x32xf32, #tpu.memory_space<vmem>>, vector<16x8xf32>,
    %c0_42 = arith.constant 0 : index
    %c0_43 = arith.constant 0 : index
    %97 = vector.load %arg13[%c0_42, %c0_43] : memref<16x32xf32, #tpu.memory_space<vmem>>, vector<16x32xf32>
    %c0_44 = arith.constant 0 : index
    %c0_45 = arith.constant 0 : index
    %98 = vector.load %arg10[%c0_44, %c0_45] : memref<32x32xf32, #tpu.memory_space<vmem>>, vector<32x32xf32>
    %cst_46 = arith.constant dense<0.000000e+00> : vector<16x32xf32>
    %99 = tpu.matmul %97, %98, %cst_46 {dimension_numbers = #tpu.dot_dimension_numbers<[1], [0], [0], [1], [0, 0, 1, 1], [], []>} : vector<16x32xf32>, vector<32x32xf32>, vector<16x32xf32> -> vector<16x32xf32>
    %c0_47 = arith.constant 0 : index
    %c0_48 = arith.constant 0 : index
    %100 = vector.load %arg11[%c0_47, %c0_48] : memref<1x32xf32, #tpu.memory_space<vmem>>, vector<1x32xf32>
    %101 = vector.broadcast %100 : vector<1x32xf32> to vector<16x32xf32>
    %102 = arith.addf %99, %101 : vector<16x32xf32>
    %c0_49 = arith.constant 0 : index
    %c0_50 = arith.constant 0 : index
    %c0_51 = arith.constant 0 : index
    %103 = vector.load %arg12[%c0_49, %c0_50, %c0_51] : memref<1x16x32xf32, #tpu.memory_space<vmem>>, vector<1x16x32xf32>
    %104 = vector.shape_cast %103 : vector<1x16x32xf32> to vector<16x32xf32>
    %105 = vector.shape_cast %102 : vector<16x32xf32> to vector<1x16x32xf32>
    tpu.vector_store %arg12[%c0_49, %c0_50, %c0_51], %105 {strides = array<i32>} : memref<1x16x32xf32, #tpu.memory_space<vmem>>, vector<1x16x32xf32>,
    return
  }
  func.func @transform_0(%arg0: i32, %arg1: i32) -> (i32, i32, i32) {
    %c0_i32 = arith.constant 0 : i32
    %c0_i32_0 = arith.constant 0 : i32
    return %arg0, %arg1, %c0_i32 : i32, i32, i32
  }
  func.func @transform_1(%arg0: i32, %arg1: i32) -> (i32, i32, i32) {
    %c0_i32 = arith.constant 0 : i32
    %c0_i32_0 = arith.constant 0 : i32
    %c0_i32_1 = arith.constant 0 : i32
    return %arg0, %c0_i32, %c0_i32_0 : i32, i32, i32
  }
  func.func @transform_2(%arg0: i32, %arg1: i32) -> (i32, i32) {
    %c0_i32 = arith.constant 0 : i32
    %c0_i32_0 = arith.constant 0 : i32
    %c0_i32_1 = arith.constant 0 : i32
    return %c0_i32, %c0_i32_0 : i32, i32
  }
  func.func @transform_3(%arg0: i32, %arg1: i32) -> (i32, i32) {
    %c0_i32 = arith.constant 0 : i32
    %c0_i32_0 = arith.constant 0 : i32
    %c0_i32_1 = arith.constant 0 : i32
    return %c0_i32, %c0_i32_0 : i32, i32
  }
  func.func @transform_4(%arg0: i32, %arg1: i32) -> (i32, i32) {
    %c0_i32 = arith.constant 0 : i32
    %c0_i32_0 = arith.constant 0 : i32
    %c0_i32_1 = arith.constant 0 : i32
    return %c0_i32, %c0_i32_0 : i32, i32
  }
  func.func @transform_5(%arg0: i32, %arg1: i32) -> (i32, i32) {
    %c0_i32 = arith.constant 0 : i32
    %c0_i32_0 = arith.constant 0 : i32
    %c0_i32_1 = arith.constant 0 : i32
    return %c0_i32, %c0_i32_0 : i32, i32
  }
  func.func @transform_6(%arg0: i32, %arg1: i32) -> (i32, i32) {
    %c0_i32 = arith.constant 0 : i32
    %c0_i32_0 = arith.constant 0 : i32
    %c0_i32_1 = arith.constant 0 : i32
    return %c0_i32, %c0_i32_0 : i32, i32
  }
  func.func @transform_7(%arg0: i32, %arg1: i32) -> (i32, i32) {
    %c0_i32 = arith.constant 0 : i32
    %c0_i32_0 = arith.constant 0 : i32
    %c0_i32_1 = arith.constant 0 : i32
    return %c0_i32, %c0_i32_0 : i32, i32
  }
  func.func @transform_8(%arg0: i32, %arg1: i32) -> (i32, i32) {
    %c0_i32 = arith.constant 0 : i32
    %c0_i32_0 = arith.constant 0 : i32
    %c0_i32_1 = arith.constant 0 : i32
    return %c0_i32, %c0_i32_0 : i32, i32
  }
  func.func @transform_9(%arg0: i32, %arg1: i32) -> (i32, i32) {
    %c0_i32 = arith.constant 0 : i32
    %c0_i32_0 = arith.constant 0 : i32
    %c0_i32_1 = arith.constant 0 : i32
    return %c0_i32, %c0_i32_0 : i32, i32
  }
  func.func @transform_10(%arg0: i32, %arg1: i32) -> (i32, i32, i32) {
    %c0_i32 = arith.constant 0 : i32
    %c0_i32_0 = arith.constant 0 : i32
    return %arg0, %arg1, %c0_i32 : i32, i32, i32
  }
}

</mosaic_0001>

<bundles_post_ra>
// kernel: tpu_custom_call.1
= control target key start
LH: loop header
LB: loop body
LE: loop exit
PB: predicated region body
PF: predicated region fallthrough
CT: control target
= control target key end

     0   :  { %s5285_s0 = inlined_call_operand.hbm [shape: f32[2,16,32], index: 0, kind: input, shape index: {}]   ;;  %s5286_s1 = inlined_call_operand.hbm [shape: f32[2,128,16], index: 1, kind: input, shape index: {}]   ;;  %s5287_s2 = inlined_call_operand.hbm [shape: f32[32,32], index: 2, kind: input, shape index: {}]   ;;  %s5288_s3 = inlined_call_operand.hbm [shape: f32[1,32], index: 3, kind: input, shape index: {}]   ;;  %s5289_s4 = inlined_call_operand.hbm [shape: f32[16,32], index: 4, kind: input, shape index: {}]   ;;  %s5290_s5 = inlined_call_operand.hbm [shape: f32[1,32], index: 5, kind: input, shape index: {}]   ;;  %s5291_s6 = inlined_call_operand.hbm [shape: f32[16,32], index: 6, kind: input, shape index: {}]   ;;  %s5292_s7 = inlined_call_operand.hbm [shape: f32[1,32], index: 7, kind: input, shape index: {}]   ;;  %s5293_s8 = inlined_call_operand.hbm [shape: f32[32,32], index: 8, kind: input, shape index: {}]   ;;  %s5294_s9 = inlined_call_operand.hbm [shape: f32[1,32], index: 9, kind: input, shape index: {}]   ;;  %s5295_s10 = inlined_call_operand.hbm [shape: f32[2,16,32], index: 10, kind: output, shape index: {}]  }
   0x1   :  { %5306 = sst [smem:[#allocation31_spill]] %s5285_s0 }
   0x2   :  { %5307 = sst [smem:[#allocation32_spill]] %s5286_s1 }
   0x3   :  { %5308 = sst [smem:[#allocation33_spill]] %s5287_s2 }
   0x4   :  { %5309 = sst [smem:[#allocation34_spill]] %s5288_s3 }
   0x5   :  { %5310 = sst [smem:[#allocation35_spill]] %s5289_s4 }
   0x6   :  { %5311 = sst [smem:[#allocation36_spill]] %s5290_s5 }
   0x7   :  { %5312 = sst [smem:[#allocation37_spill]] %s5291_s6 }
   0x8   :  { %5313 = sst [smem:[#allocation38_spill]] %s5292_s7 }
   0x9   :  { %5314 = sst [smem:[#allocation39_spill]] %s5295_s10 }
   0xa   :  { %15 = vsyncpa [#allocation4], 0 }
   0xb   :  { %17 = vsyncpa [#allocation4 + $0x1], 0 }
   0xc   :  { %18 = vsyncpa [#allocation7], 0 }
   0xd   :  { %20 = vsyncpa [#allocation7 + $0x1], 0 }
   0xe   :  { %21 = vsyncpa [#allocation10], 0 }
   0xf   :  { %22 = vsyncpa [#allocation13], 0 }
  0x10   :  { %23 = vsyncpa [#allocation16], 0 }
  0x11   :  { %24 = vsyncpa [#allocation19], 0 }
  0x12   :  { %25 = vsyncpa [#allocation5], 0 }
  0x13   :  { %27 = vsyncpa [#allocation5 + $0x1], 0  ;;  %s4396_s13 = smov 0   ;;  %s4398_s14 = smov 0  }
  0x14   :  { %s4400_s15 = smov 0   ;;  %s4402_s16 = smov 0  }
  0x15   :  { %s4404_s17 = smov 0   ;;  %s4406_s18 = smov 0  }
  0x16 LB: > { %5315 = sst [smem:[#allocation29_spill]] %s4310_s16  ;;  %s4427_s19 = sadd.s32 4294967295, %s4318_s18   ;;  %s4318_s18 = sphi %s4406_s18, %s33_s18   ;;  %s4314_s17 = sphi %s4404_s17, %s5360_s17   ;;  %s4310_s16 = sphi %s4402_s16, %s5359_s16   ;;  %s4306_s15 = sphi %s4400_s15, %s5358_s15   ;;  %s4302_s14 = sphi %s4398_s14, %s5357_s14   ;;  %s4298_s13 = sphi %s4396_s13, %s5356_s13  }
  0x17   : > { %p2456_p0 = scmp.ge.s32.totalorder %s4318_s18, 1  ;;  %p5299_p1 = scmp.eq.s32.totalorder %s4427_s19, 0 }
  0x18   : > { %p300_p2 = scmp.lt.s32.totalorder %s4318_s18, 3  ;;  %s4320_s21 = smov [#allocation8]  }
  0x19   : > { %s312_s22 = sshll.u32 %s4320_s21, 4  ;;  %s4321_s24 = smov [#allocation9]   ;;  %s4436_s22 = int_to_ptr.vmem [resolvable:$true] %s312_s22 }
  0x1a   : > { %p4432_p3 = pnand %p2456_p0, %p300_p2  ;;  %s326_s25 = sshll.u32 %s4321_s24, 4  ;;  %s4447_s25 = int_to_ptr.vmem [resolvable:$true] %s326_s25 }
  0x1b   : > { %s4322_s26 = smov [#allocation12]   ;;  %s5319_s2 = sld [smem:[#allocation33_spill]] }
  0x1c   : > { %s5316_s20 = scalar_select %p4432_p3, 1, 0 }
  0x1d   : > { %p3536_p4 = pneg %p4432_p3  ;;  %s4449_s27 = sshll.u32 %s4322_s26, 4  ;;  %s351_s27 = int_to_ptr.vmem [resolvable:$true] %s4449_s27 }
  0x1e   : > { %5317 = sst [smem:[#allocation30_spill]] %s5316_s20 }
  0x1f   : > { %p4443_p6 = pnand %p3536_p4, %p5299_p1 }
  0x21   : > { %s3928_s30 = scalar_lea.hbm %s5319_s2, 512  ;;  %p4459_p8 = pneg %p4443_p6 }
  0x22   : > { %p3929_p7 = scmp.ne.s32.totalorder %s5319_s2, %s3928_s30  ;;  %p3935_p11 = scmp.lt.u32.totalorder %s3928_s30, %s5319_s2 }
  0x24   : > { %p3931_p9 = pnand %p4459_p8, %p3929_p7 }
  0x26   : > { %p3932_p10 = pneg %p3931_p9 }
  0x28   : > { %p3937_p12 = pnand %p3935_p11, %p3932_p10 }
  0x2a   : > { %3940 = shalt.err (!%p3937_p12)
}
  0x2b   : > { %s3941_s28 = scalar_lea.vmem %s4436_s22, 512  ;;  %p3949_p4 = scmp.lt.s32.totalorder %s4436_s22, %s4436_s22 }
  0x2c   : > { %p3942_p13 = scmp.ne.s32.totalorder %s4436_s22, %s3941_s28  ;;  %p3950_p5 = scmp.lt.s32.totalorder %s3941_s28, %s3941_s28 }
  0x2e   : > { %p3944_p0 = pnand %p3942_p13, %p4459_p8  ;;  %p3951_p7 = por %p3950_p5, %p3949_p4 }
  0x30   : > { %p3945_p2 = pneg %p3944_p0 }
  0x32   : > { %p3952_p9 = pnand %p3951_p7, %p3945_p2 }
  0x34   : > { %3955 = shalt.err (!%p3952_p9)
}
  0x35   : > { %s5301_s29 = smov 128   ;;  %s5303_s30 = smov 8  }
  0x36   : > { %3539 = dma.hbm_to_vmem [thread:$0]  (!%p4443_p6), %s5319_s2, 512, %s4436_s22, [#allocation7], %s5301_s29, %s5301_s29, %s5303_s30  }
  0x37   : > { %s5321_s3 = sld [smem:[#allocation34_spill]] }
  0x3d   : > { %s3956_s28 = scalar_lea.hbm %s5321_s3, 16 }
  0x3e   : > { %p3957_p5 = scmp.ne.s32.totalorder %s5321_s3, %s3956_s28  ;;  %p3963_p12 = scmp.lt.u32.totalorder %s3956_s28, %s5321_s3 }
  0x40   : > { %p3959_p10 = pnand %p3957_p5, %p4459_p8 }
  0x42   : > { %p3960_p11 = pneg %p3959_p10 }
  0x44   : > { %p3965_p13 = pnand %p3963_p12, %p3960_p11 }
  0x46   : > { %3968 = shalt.err (!%p3965_p13)
}
  0x47   : > { %s3969_s22 = scalar_lea.vmem %s4447_s25, 16  ;;  %s3976_s10 = scalar_lea.vmem %s4447_s25, 32 }
  0x48   : > { %p3970_p0 = scmp.ne.s32.totalorder %s4447_s25, %s3969_s22  ;;  %p3977_p7 = scmp.lt.s32.totalorder %s4447_s25, %s4447_s25 }
  0x49   : > { %p3978_p9 = scmp.lt.s32.totalorder %s3976_s10, %s3969_s22 }
  0x4a   : > { %p3972_p2 = pnand %p3970_p0, %p4459_p8 }
  0x4b   : > { %p3979_p5 = por %p3978_p9, %p3977_p7 }
  0x4c   : > { %p3973_p4 = pneg %p3972_p2 }
  0x4e   : > { %p3980_p10 = pnand %p3979_p5, %p3973_p4 }
  0x50   : > { %3983 = shalt.err (!%p3980_p10)
}
  0x51   : > { %3542 = dma.hbm_to_vmem [thread:$0]  (!%p4443_p6), %s5321_s3, 16, %s4447_s25, [#allocation10]  }
  0x52   : > { %s5322_s5 = sld [smem:[#allocation36_spill]] }
  0x58   : > { %s3984_s12 = scalar_lea.hbm %s5322_s5, 16 }
  0x59   : > { %p3985_p11 = scmp.ne.s32.totalorder %s5322_s5, %s3984_s12  ;;  %p3991_p0 = scmp.lt.u32.totalorder %s3984_s12, %s5322_s5 }
  0x5b   : > { %p3987_p12 = pnand %p3985_p11, %p4459_p8 }
  0x5d   : > { %p3988_p13 = pneg %p3987_p12 }
  0x5f   : > { %p3993_p2 = pnand %p3991_p0, %p3988_p13 }
  0x61   : > { %3996 = shalt.err (!%p3993_p2)
}
  0x62   : > { %s3997_s10 = scalar_lea.vmem %s351_s27, 16  ;;  %s4004_s25 = scalar_lea.vmem %s351_s27, 32 }
  0x63   : > { %p3998_p4 = scmp.ne.s32.totalorder %s351_s27, %s3997_s10  ;;  %p4005_p5 = scmp.lt.s32.totalorder %s351_s27, %s351_s27 }
  0x64   : > { %p4006_p10 = scmp.lt.s32.totalorder %s4004_s25, %s3997_s10 }
  0x65   : > { %p4000_p7 = pnand %p3998_p4, %p4459_p8 }
  0x66   : > { %p4007_p1 = por %p4006_p10, %p4005_p5 }
  0x67   : > { %p4001_p9 = pneg %p4000_p7 }
  0x69   : > { %p4008_p3 = pnand %p4007_p1, %p4001_p9 }
  0x6b   : > { %4011 = shalt.err (!%p4008_p3)
}
  0x6c   : > { %3548 = dma.hbm_to_vmem [thread:$0]  (!%p4443_p6), %s5322_s5, 16, %s351_s27, [#allocation13]  }
  0x6d   : > { %s4325_s20 = smov [#allocation15]   ;;  %s4326_s12 = smov [#allocation11]  }
  0x6e   : > { %s374_s11 = sshll.u32 %s4325_s20, 4  ;;  %s336_s24 = sshll.u32 %s4326_s12, 4  ;;  %s375_s11 = int_to_ptr.vmem [resolvable:$true] %s374_s11  ;;  %s337_s24 = int_to_ptr.vmem [resolvable:$true] %s336_s24 }
  0x6f   : > { %s5323_s7 = sld [smem:[#allocation38_spill]] }
  0x75   : > { %s4012_s22 = scalar_lea.hbm %s5323_s7, 16 }
  0x76   : > { %p4013_p1 = scmp.ne.s32.totalorder %s5323_s7, %s4012_s22  ;;  %p4019_p12 = scmp.lt.u32.totalorder %s4012_s22, %s5323_s7 }
  0x78   : > { %p4015_p3 = pnand %p4013_p1, %p4459_p8 }
  0x7a   : > { %p4016_p11 = pneg %p4015_p3 }
  0x7c   : > { %p4021_p13 = pnand %p4019_p12, %p4016_p11 }
  0x7e   : > { %4024 = shalt.err (!%p4021_p13)
}
  0x7f   : > { %s4025_s27 = scalar_lea.vmem %s375_s11, 16  ;;  %s4032_s16 = scalar_lea.vmem %s375_s11, 32 }
  0x80   : > { %p4026_p0 = scmp.ne.s32.totalorder %s375_s11, %s4025_s27  ;;  %p4033_p7 = scmp.lt.s32.totalorder %s375_s11, %s375_s11 }
  0x81   : > { %p4034_p9 = scmp.lt.s32.totalorder %s4032_s16, %s4025_s27 }
  0x82   : > { %p4028_p2 = pnand %p4026_p0, %p4459_p8 }
  0x83   : > { %p4035_p5 = por %p4034_p9, %p4033_p7 }
  0x84   : > { %p4029_p4 = pneg %p4028_p2 }
  0x86   : > { %p4036_p10 = pnand %p4035_p5, %p4029_p4 }
  0x88   : > { %4039 = shalt.err (!%p4036_p10)
}
  0x89   : > { %3554 = dma.hbm_to_vmem [thread:$0]  (!%p4443_p6), %s5323_s7, 16, %s375_s11, [#allocation16]  }
  0x8a   : > { %s5324_s4 = sld [smem:[#allocation35_spill]] }
  0x90   : > { %s4040_s28 = scalar_lea.hbm %s5324_s4, 256 }
  0x91   : > { %p4041_p1 = scmp.ne.s32.totalorder %s5324_s4, %s4040_s28  ;;  %p4047_p12 = scmp.lt.u32.totalorder %s4040_s28, %s5324_s4 }
  0x93   : > { %p4043_p3 = pnand %p4041_p1, %p4459_p8 }
  0x95   : > { %p4044_p11 = pneg %p4043_p3 }
  0x97   : > { %p4049_p13 = pnand %p4047_p12, %p4044_p11 }
  0x99   : > { %4052 = shalt.err (!%p4049_p13)
}
  0x9a   : > { %s4053_s27 = scalar_lea.vmem %s337_s24, 256  ;;  %p4061_p7 = scmp.lt.s32.totalorder %s337_s24, %s337_s24 }
  0x9b   : > { %p4054_p0 = scmp.ne.s32.totalorder %s337_s24, %s4053_s27  ;;  %p4062_p9 = scmp.lt.s32.totalorder %s4053_s27, %s4053_s27 }
  0x9d   : > { %p4056_p2 = pnand %p4054_p0, %p4459_p8  ;;  %p4063_p5 = por %p4062_p9, %p4061_p7 }
  0x9f   : > { %p4057_p4 = pneg %p4056_p2 }
  0xa1   : > { %p4064_p10 = pnand %p4063_p5, %p4057_p4 }
  0xa3   : > { %4067 = shalt.err (!%p4064_p10)
}
  0xa4   : > { %s5325_s11 = smov 128   ;;  %s4327_s12 = smov [#allocation14]  }
  0xa5   : > { %3545 = dma.hbm_to_vmem [thread:$0]  (!%p4443_p6), %s5324_s4, 256, %s337_s24, [#allocation10], %s5325_s11, %s5325_s11, %s5303_s30  }
  0xa6   : > { %s360_s29 = sshll.u32 %s4327_s12, 4  ;;  %s4328_s26 = smov [#allocation17]   ;;  %s361_s29 = int_to_ptr.vmem [resolvable:$true] %s360_s29 }
  0xa7   : > { %s384_s28 = sshll.u32 %s4328_s26, 4  ;;  %s5326_s6 = sld [smem:[#allocation37_spill]]  ;;  %s385_s28 = int_to_ptr.vmem [resolvable:$true] %s384_s28 }
  0xad   : > { %s4068_s25 = scalar_lea.hbm %s5326_s6, 256 }
  0xae   : > { %p4069_p1 = scmp.ne.s32.totalorder %s5326_s6, %s4068_s25  ;;  %p4075_p12 = scmp.lt.u32.totalorder %s4068_s25, %s5326_s6 }
  0xb0   : > { %p4071_p3 = pnand %p4069_p1, %p4459_p8 }
  0xb2   : > { %p4072_p11 = pneg %p4071_p3 }
  0xb4   : > { %p4077_p13 = pnand %p4075_p12, %p4072_p11 }
  0xb6   : > { %4080 = shalt.err (!%p4077_p13)
}
  0xb7   : > { %s4081_s24 = scalar_lea.vmem %s361_s29, 256  ;;  %p4089_p7 = scmp.lt.s32.totalorder %s361_s29, %s361_s29 }
  0xb8   : > { %p4082_p0 = scmp.ne.s32.totalorder %s361_s29, %s4081_s24  ;;  %p4090_p9 = scmp.lt.s32.totalorder %s4081_s24, %s4081_s24 }
  0xba   : > { %p4084_p2 = pnand %p4082_p0, %p4459_p8  ;;  %p4091_p5 = por %p4090_p9, %p4089_p7 }
  0xbc   : > { %p4085_p4 = pneg %p4084_p2 }
  0xbe   : > { %p4092_p10 = pnand %p4091_p5, %p4085_p4 }
  0xc0   : > { %4095 = shalt.err (!%p4092_p10)
}
  0xc1   : > { %3551 = dma.hbm_to_vmem [thread:$0]  (!%p4443_p6), %s5326_s6, 256, %s361_s29, [#allocation13], %s5325_s11, %s5325_s11, %s5303_s30  }
  0xc2   : > { %s4096_s22 = scalar_lea.hbm %s5293_s8, 512 }
  0xc3   : > { %p4097_p1 = scmp.ne.s32.totalorder %s5293_s8, %s4096_s22  ;;  %p4103_p12 = scmp.lt.u32.totalorder %s4096_s22, %s5293_s8 }
  0xc5   : > { %p4099_p3 = pnand %p4097_p1, %p4459_p8 }
  0xc7   : > { %p4100_p11 = pneg %p4099_p3 }
  0xc9   : > { %p4105_p13 = pnand %p4103_p12, %p4100_p11 }
  0xcb   : > { %4108 = shalt.err (!%p4105_p13)
}
  0xcc   : > { %s4109_s16 = scalar_lea.vmem %s385_s28, 512  ;;  %p4117_p7 = scmp.lt.s32.totalorder %s385_s28, %s385_s28 }
  0xcd   : > { %p4110_p0 = scmp.ne.s32.totalorder %s385_s28, %s4109_s16  ;;  %p4118_p9 = scmp.lt.s32.totalorder %s4109_s16, %s4109_s16 }
  0xcf   : > { %p4112_p2 = pnand %p4110_p0, %p4459_p8  ;;  %p4119_p5 = por %p4118_p9, %p4117_p7 }
  0xd1   : > { %p4113_p4 = pneg %p4112_p2 }
  0xd3   : > { %p4120_p10 = pnand %p4119_p5, %p4113_p4 }
  0xd5   : > { %4123 = shalt.err (!%p4120_p10)
}
  0xd6   : > { %3557 = dma.hbm_to_vmem [thread:$0]  (!%p4443_p6), %s5293_s8, 512, %s385_s28, [#allocation16], %s5325_s11, %s5325_s11, %s5303_s30  }
  0xd7   : > { %s4329_s2 = smov [#allocation18]   ;;  %s4124_s22 = scalar_lea.hbm %s5294_s9, 16 }
  0xd8   : > { %s398_s20 = sshll.u32 %s4329_s2, 4  ;;  %p4125_p1 = scmp.ne.s32.totalorder %s5294_s9, %s4124_s22  ;;  %s399_s20 = int_to_ptr.vmem [resolvable:$true] %s398_s20 }
  0xd9   : > { %p4131_p12 = scmp.lt.u32.totalorder %s4124_s22, %s5294_s9 }
  0xda   : > { %p4127_p3 = pnand %p4125_p1, %p4459_p8 }
  0xdc   : > { %p4128_p11 = pneg %p4127_p3 }
  0xde   : > { %p4133_p13 = pnand %p4131_p12, %p4128_p11 }
  0xe0   : > { %4136 = shalt.err (!%p4133_p13)
}
  0xe1   : > { %s4137_s28 = scalar_lea.vmem %s399_s20, 16  ;;  %s4144_s16 = scalar_lea.vmem %s399_s20, 32 }
  0xe2   : > { %p4138_p0 = scmp.ne.s32.totalorder %s399_s20, %s4137_s28  ;;  %p4145_p7 = scmp.lt.s32.totalorder %s399_s20, %s399_s20 }
  0xe3   : > { %p4146_p9 = scmp.lt.s32.totalorder %s4144_s16, %s4137_s28 }
  0xe4   : > { %p4140_p2 = pnand %p4138_p0, %p4459_p8 }
  0xe5   : > { %p4147_p5 = por %p4146_p9, %p4145_p7 }
  0xe6   : > { %p4141_p4 = pneg %p4140_p2 }
  0xe8   : > { %p4148_p10 = pnand %p4147_p5, %p4141_p4 }
  0xea   : > { %4151 = shalt.err (!%p4148_p10)
}
  0xeb   : > { %3560 = dma.hbm_to_vmem [thread:$0]  (!%p4443_p6), %s5294_s9, 16, %s399_s20, [#allocation19]  }
  0xec   : > { %s2455_s21 = sadd.s32 4294967294, %s4318_s18   ;;  %s45_s2 = sadd.s32 1, %s4314_s17 }
  0xed   : > { %p47_p8 = scmp.ge.s32.totalorder %s45_s2, 2  ;;  %s54_s23 = sadd.s32 1, %s4306_s15 }
  0xee   : > { %p61_p1 = scmp.ne.s32.totalorder %s4306_s15, %s4302_s14  ;;  %p62_p3 = scmp.eq.s32.totalorder %s4318_s18, 0 }
  0xef   : > { %s5362_s2 = smov (%p47_p8, %s45_s2), 0  ;;  %p67_p12 = scmp.ne.s32.totalorder %s4302_s14, %s4298_s13 }
  0xf0   : > { %p4633_p11 = por %p62_p3, %p61_p1  ;;  %s49_s20 = ssub.s32 %s4314_s17, %s5362_s2 }
  0xf1   : > { %p287_p6 = scmp.eq.s32.totalorder %s4427_s19, 1  ;;  %p52_p13 = scmp.eq.s32.totalorder %s49_s20, 0 }
  0xf2   : > { %p5328_p0 = scmp.eq.s32.totalorder %s4427_s19, 0  ;;  %p293_p7 = scmp.eq.s32.totalorder %s2455_s21, 1 }
  0xf3   : > { %p4648_p4 = por %p287_p6, %p61_p1  ;;  %p3580_p5 = scmp.lt.s32.totalorder %s4318_s18, 2 }
  0xf4   : > { %p4644_p2 = por %p5328_p0, %p67_p12  ;;  %p4655_p9 = por %p293_p7, %p67_p12 }
  0xf5   : > { %s5330_s22 = scalar_select %p4648_p4, 1, 0 }
  0xf6   : > { %s4653_s10 = scalar_select %p52_p13, %s4306_s15, %s54_s23  }
  0xf7   : > { %s5331_s25 = scalar_select %p4655_p9, 1, 0 }
  0xf8   : > { %s4661_s1 = sand.u32 1, %s4306_s15   ;;  %s2601_s27 = sshll.u32 %s4314_s17, 8 }
  0xf9   : > { %s2466_s28 = sshll.u32 %s4661_s1, 4  ;;  %s5332_s0 = sld [smem:[#allocation31_spill]] }
  0xfa   : > { %s413_s21 = scalar_lea.vmem [#allocation3], %s2466_s28  ;;  %p4672_p10 = pnand %p3580_p5, %p4633_p11 }
  0xfb   : > { %s422_s23 = sshll.u32 %s413_s21, 4  ;;  %s410_s3 = scalar_lea.sflag [#allocation4], %s4661_s1  ;;  %s4676_s23 = int_to_ptr.vmem [resolvable:$true] %s422_s23 }
  0xfc   : > { %p4154_p1 = pneg %p4672_p10 }
  0xff   : > { %s4668_s24 = scalar_lea.hbm %s5332_s0, %s2601_s27  ;;  %s4157_s28 = scalar_lea.hbm %s5332_s0, 512 }
 0x100   : > { %s4152_s16 = scalar_lea.hbm %s4668_s24, 256  ;;  %p4158_p11 = scmp.lt.u32.totalorder %s4668_s24, %s5332_s0 }
 0x101   : > { %p4153_p8 = scmp.ne.s32.totalorder %s4668_s24, %s4152_s16  ;;  %p4159_p6 = scmp.lt.u32.totalorder %s4157_s28, %s4152_s16 }
 0x102   : > { %p4161_p0 = scmp.lt.u32.totalorder %s4152_s16, %s4668_s24 }
 0x103   : > { %p4155_p3 = pnand %p4154_p1, %p4153_p8  ;;  %p4160_p13 = por %p4159_p6, %p4158_p11 }
 0x105   : > { %p4156_p12 = pneg %p4155_p3  ;;  %p4162_p7 = por %p4161_p0, %p4160_p13 }
 0x107   : > { %p4163_p5 = pnand %p4162_p7, %p4156_p12 }
 0x109   : > { %4166 = shalt.err (!%p4163_p5)
}
 0x10a   : > { %s4167_s30 = scalar_lea.vmem %s4676_s23, 256  ;;  %s4330_s27 = smov [#allocation3]  }
 0x10b   : > { %p4168_p8 = scmp.ne.s32.totalorder %s4676_s23, %s4167_s30  ;;  %s4172_s12 = sshll.u32 %s4330_s27, 4  ;;  %s4173_s12 = int_to_ptr.vmem [resolvable:$false] %s4172_s12 }
 0x10c   : > { %s4174_s29 = scalar_lea.vmem %s4173_s12, 512  ;;  %p4175_p4 = scmp.lt.s32.totalorder %s4676_s23, %s4173_s12 }
 0x10d   : > { %p4170_p3 = pnand %p4168_p8, %p4154_p1  ;;  %p4176_p11 = scmp.lt.s32.totalorder %s4174_s29, %s4167_s30 }
 0x10f   : > { %p4171_p9 = pneg %p4170_p3  ;;  %p4177_p6 = por %p4176_p11, %p4175_p4 }
 0x111   : > { %p4178_p13 = pnand %p4177_p6, %p4171_p9 }
 0x113   : > { %4181 = shalt.err (!%p4178_p13)
}
 0x114   : > { %s5334_s16 = smov 8   ;;  %s2469_s28 = sshll.u32 %s4661_s1, 7 }
 0x115   : > { %3564 = dma.hbm_to_vmem [thread:$0]  (!%p4672_p10), %s4668_s24, 256, %s4676_s23, %s410_s3, %s5325_s11, %s5325_s11, %s5334_s16  }
 0x116   : > { %s2602_s21 = sshll.u32 %s4314_s17, 11  ;;  %s5335_s12 = sld [smem:[#allocation32_spill]] }
 0x117   : > { %s436_s0 = scalar_lea.vmem [#allocation6], %s2469_s28  ;;  %s5336_s5 = sand.u32 1, %s4318_s18  }
 0x118   : > { %s443_s4 = sshll.u32 %s436_s0, 4  ;;  %s4721_s6 = scalar_lea.sflag [#allocation7], %s5336_s5  ;;  %s4717_s4 = int_to_ptr.vmem [resolvable:$true] %s443_s4 }
 0x11c   : > { %s4715_s29 = scalar_lea.hbm %s5335_s12, %s2602_s21  ;;  %s4187_s24 = scalar_lea.hbm %s5335_s12, 4096 }
 0x11d   : > { %s4182_s7 = scalar_lea.hbm %s4715_s29, 2048  ;;  %p4188_p0 = scmp.lt.u32.totalorder %s4715_s29, %s5335_s12 }
 0x11e   : > { %p4183_p4 = scmp.ne.s32.totalorder %s4715_s29, %s4182_s7  ;;  %p4189_p7 = scmp.lt.u32.totalorder %s4187_s24, %s4182_s7 }
 0x11f   : > { %p4191_p8 = scmp.lt.u32.totalorder %s4182_s7, %s4715_s29 }
 0x120   : > { %p4185_p9 = pnand %p4183_p4, %p4154_p1  ;;  %p4190_p5 = por %p4189_p7, %p4188_p0 }
 0x122   : > { %p4186_p12 = pneg %p4185_p9  ;;  %p4192_p3 = por %p4191_p8, %p4190_p5 }
 0x124   : > { %p4193_p11 = pnand %p4192_p3, %p4186_p12 }
 0x126   : > { %4196 = shalt.err (!%p4193_p11)
}
 0x127   : > { %s4197_s0 = scalar_lea.vmem %s4717_s4, 2048  ;;  %s4331_s5 = smov [#allocation6]  }
 0x128   : > { %p4198_p6 = scmp.ne.s32.totalorder %s4717_s4, %s4197_s0  ;;  %s4202_s28 = sshll.u32 %s4331_s5, 4  ;;  %s4203_s28 = int_to_ptr.vmem [resolvable:$false] %s4202_s28 }
 0x129   : > { %s4204_s30 = scalar_lea.vmem %s4203_s28, 4096  ;;  %p4205_p9 = scmp.lt.s32.totalorder %s4717_s4, %s4203_s28 }
 0x12a   : > { %p4200_p13 = pnand %p4198_p6, %p4154_p1  ;;  %p4206_p0 = scmp.lt.s32.totalorder %s4204_s30, %s4197_s0 }
 0x12c   : > { %p4201_p4 = pneg %p4200_p13  ;;  %p4207_p7 = por %p4206_p0, %p4205_p9 }
 0x12e   : > { %p4208_p5 = pnand %p4207_p7, %p4201_p4 }
 0x130   : > { %4211 = shalt.err (!%p4208_p5)
}
 0x131   : > { %3567 = dma.hbm_to_vmem [thread:$0]  (!%p4672_p10), %s4715_s29, 2048, %s4717_s4, %s4721_s6, %s5325_s11, %s5325_s11, %s5334_s16  }
 0x132   : > { %s5337_s7 = sld [smem:[#allocation30_spill]] }
 0x138   : > { %p5338_p1 = scmp.ne.s32.totalorder %s5337_s7, 0 }
 0x139   : > { %s4753_s27 = sand.u32 (!%p5338_p1), 1, %s4302_s14  }
 0x13a   : > { %455 = sbr.rel (%p5338_p1) target bundleno = 3510 (0xdb6), region = 60  ;;  %s2473_s3 = sshll.u32 (!%p5338_p1), %s4753_s27, 4 }
 0x13b   : > { %s458_s1 = scalar_lea.sflag (!%p5338_p1), [#allocation4], %s4753_s27  ;;  %s4759_s20 = scalar_lea.vmem (!%p5338_p1), [#allocation3], %s2473_s3 }
 0x141   : > { %4265 = dma.done.wait (%p4644_p2), %s458_s1, 256  }
 0x142   : > { %4267 = vsyncadd (%p4644_p2), %s458_s1, 4294967040  ;;  %s466_s4 = sand.u32 1, %s4427_s19   ;;  %s2474_s6 = sshll.u32 %s4753_s27, 7 }
 0x143   : > { %s467_s11 = scalar_lea.sflag [#allocation7], %s466_s4  ;;  %s4767_s16 = scalar_lea.vmem [#allocation6], %s2474_s6 }
 0x144   : > { %4269 = dma.done.wait (%p4644_p2), %s467_s11, 2048  }
 0x145   : > { %4271 = vsyncadd (%p4644_p2), %s467_s11, 4294965248  ;;  %p5339_p10 = scmp.eq.s32.totalorder %s4427_s19, 0 }
 0x147   : > { %4273 = dma.done.wait (%p5339_p10), [#allocation7], 512   ;;  %p5340_p12 = pmov %p5339_p10 }
 0x148   : > { %p5341_p8 = pmov %p5339_p10 }
 0x149   : > { %4275 = vsyncadd (%p5340_p12), [#allocation7], 4294966784 }
 0x14a   : > { %4277 = dma.done.wait (%p5341_p8), [#allocation10], 272   ;;  %p5342_p3 = pmov %p5341_p8 }
 0x14c   : > { %4279 = vsyncadd (%p5342_p3), [#allocation10], 4294967024  ;;  %p5343_p11 = pmov %p5342_p3 }
 0x14d   : > { %p5344_p6 = pmov %p5342_p3 }
 0x14e   : > { %4281 = dma.done.wait (%p5343_p11), [#allocation13], 272  }
 0x14f   : > { %4283 = vsyncadd (%p5344_p6), [#allocation13], 4294967024  ;;  %p5345_p2 = pmov %p5342_p3 }
 0x151   : > { %4285 = dma.done.wait (%p5345_p2), [#allocation16], 528   ;;  %p5346_p13 = pmov %p5345_p2 }
 0x152   : > { %p5347_p4 = pmov %p5345_p2 }
 0x153   : > { %4287 = vsyncadd (%p5346_p13), [#allocation16], 4294966768 }
 0x154   : > { %4289 = dma.done.wait (%p5347_p4), [#allocation19], 16   ;;  %p5348_p9 = pmov %p5345_p2 }
 0x155   : > { %vm666_vm0 = vcmask 130048   ;;  %v657_v0 = vld [vmem:[#allocation11] sm:$0xff]  ;;  %v658_v1 = vld [vmem:[#allocation11 + $0x8] sm:$0xff]  ;;  %vm575_vm1 = vcmask 261120   ;;  %v567_v10 = vld [vmem:[#allocation8 + $0x18] sm:$0xff]  ;;  %vm1018_vm2 = vcmask 64512  }
 0x156   : > { %4291 = vsyncadd (%p5348_p9), [#allocation19], 4294967280  ;;  %v548_v2 = vld [vmem:[%s4767_s16] sm:$0xff]  ;;  %v3162_v3 = vpack.c.bf16 %v658_v1, %v657_v0  ;;  %v549_v4 = vld [vmem:[%s4767_s16 + $0x8] sm:$0xff]  ;;  %s4333_s19 = smov 120   ;;  %s4334_s26 = smov 112  }
 0x157   : > { %2811 = vmatprep.mubr.msk.f32.mxu1 %vm666_vm0, %v548_v2  ;;  %v550_v5 = vld [vmem:[%s4767_s16 + $0x10] sm:$0xff]  ;;  %v564_v6 = vld [vmem:[#allocation8] sm:$0xff]  ;;  %v565_v7 = vld [vmem:[#allocation8 + $0x8] sm:$0xff]  ;;  %s4335_s29 = smov 104   ;;  %s4336_s24 = smov 8   ;;  %vm1555_vm5 = vcmask 130112  }
 0x158   : > { %3163 = vmatprep.subr.bf16.mxu1 %v3162_v3  ;;  %v566_v8 = vld [vmem:[#allocation8 + $0x10] sm:$0xff]  ;;  %v3154_v9 = vpack.c.bf16 %v565_v7, %v564_v6  ;;  %v551_v12 = vld [vmem:[%s4767_s16 + $0x18] sm:$0xff]  ;;  %v552_v14 = vld [vmem:[%s4767_s16 + $0x20] sm:$0xff]  ;;  %s4337_s23 = smov 16   ;;  %vm1854_vm6 = vcmask 195712   ;;  %s4338_s21 = smov 24  }
 0x159   : > { %3165 = vmatpush3.bf16.msra.mxu1 %v3162_v3  ;;  %v546_v11 = vld [vmem:[%s4759_s20] sm:$0xff]  ;;  %v3158_v13 = vpack.c.bf16 %v567_v10, %v566_v8  ;;  %v553_v15 = vld [vmem:[%s4767_s16 + $0x28] sm:$0xff]  ;;  %v555_v18 = vld [vmem:[%s4767_s16 + $0x38] sm:$0xff]  ;;  %s5351_s0 = sld [smem:[#allocation29_spill]]  ;;  %vm2153_vm7 = vcmask 261312   ;;  %s543_s5 = scalar_lea.vmem [#allocation20], %s2473_s3 }
 0x15a   : > { %2804 = vmatprep.mubr.msk.f32.mxu0 %vm575_vm1, %v546_v11  ;;  %3155 = vmatprep.subr.bf16.mxu0 %v3154_v9  ;;  %v554_v16 = vld [vmem:[%s4767_s16 + $0x30] sm:$0xff]  ;;  %v547_v17 = vld [vmem:[%s4759_s20 + $0x8] sm:$0xff]  ;;  %v556_v19 = vld [vmem:[%s4767_s16 + $0x40] sm:$0xff]  ;;  %s2268_s28 = sshll.u32 %s543_s5, 4  ;;  %s5352_s20 = sld [smem:[#allocation39_spill]]  ;;  %s5228_s28 = int_to_ptr.vmem [resolvable:$true] %s2268_s28 }
 0x15b   : > { %3157 = vmatpush3.bf16.msra.mxu0 %v3154_v9  ;;  %v557_v20 = vld [vmem:[%s4767_s16 + $0x48] sm:$0xff]  ;;  %v558_v21 = vld [vmem:[%s4767_s16 + $0x50] sm:$0xff]  ;;  %v559_v22 = vld [vmem:[%s4767_s16 + $0x58] sm:$0xff]  ;;  %s2253_s3 = scalar_lea.sflag [#allocation5], %s4753_s27  ;;  %s4212_s6 = scalar_lea.vmem %s5228_s28, 256 }
 0x15c   : > { %2812 = vmatmul.mubr.msk.f32.vlgmr.msra.gmra.mrb[0].mxu1 %vm666_vm0, %v549_v4  ;;  %3159 = vmatprep.subr.bf16.mxu0 %v3158_v13  ;;  %v560_v23 = vld [vmem:[%s4767_s16 + $0x60] sm:$0xff]  ;;  %v561_v24 = vld [vmem:[%s4767_s16 + $0x68] sm:$0xff]  ;;  %v562_v25 = vld [vmem:[%s4767_s16 + $0x70] sm:$0xff]  ;;  %p4213_p0 = scmp.ne.s32.totalorder %s5228_s28, %s4212_s6  ;;  %p5353_p7 = scmp.ne.s32.totalorder %s5330_s22, 0 }
 0x15d   : > { %2814 = vmatprep.mubr.msk.f32.mxu1 %vm666_vm0, %v550_v5  ;;  %v563_v26 = vld [vmem:[%s4767_s16 + $0x78] sm:$0xff]  ;;  %v2487_v30 = vld [vmem:[#allocation12] ss:$0 sm:$0xff]  ;;  %vm4847_vm3 = vmpackc.low %vm1018_vm2, %vm1018_vm2  ;;  %s4339_s11 = smov [#allocation20]  }
 0x15e   : > { %v860_v27 = vld [vmem:[#allocation14] sm:$0xff]  ;;  %v861_v28 = vld [vmem:[#allocation14 + $0x8] sm:$0xff]  ;;  %p4214_p5 = pnand %p4213_p0, %p5353_p7  ;;  %s4216_s16 = sshll.u32 %s4339_s11, 4  ;;  %s4217_s16 = int_to_ptr.vmem [resolvable:$false] %s4216_s16 }
 0x15f   : > { %3161 = vmatpush3.bf16.msra.mxu0 %v3158_v13  ;;  %v3166_v29 = vpack.c.bf16 %v861_v28, %v860_v27  ;;  %v2484_v47 = vld [vmem:[#allocation9] ss:$0 sm:$0xff]  ;;  %s2603_s30 = sshll.u32 %s5351_s0, 8  ;;  %p4219_p10 = scmp.lt.s32.totalorder %s5228_s28, %s4217_s16 }
 0x160   : > { %2815 = vmatmul.mubr.msk.f32.gmra.mrb[2].mxu1 %vm666_vm0, %v551_v12  ;;  %s5233_s4 = scalar_lea.hbm %s5352_s20, %s2603_s30  ;;  %p4215_p1 = pneg %p4214_p5 }
 0x161   : > { %2817 = vmatprep.mubr.msk.f32.mxu1 %vm666_vm0, %v552_v14  ;;  %3167 = vmatprep.subr.bf16.mxu0 %v3166_v29 }
 0x162   : > { %2805 = vmatmul.mubr.msk.f32.vlgmr.msra.gmra.mrb[0].mxu0 %vm575_vm1, %v547_v17 }
 0x163   : > { %2839 = vmatprep.mubr.msk.f32.mxu0 %vm666_vm0, %v548_v2  ;;  %3169 = vmatpush3.bf16.msra.mxu0 %v3166_v29 }
 0x164   : > { %2818 = vmatmul.mubr.msk.f32.gmra.mrb[4].mxu1 %vm666_vm0, %v553_v15 }
 0x165   : > { %2820 = vmatprep.mubr.msk.f32.mxu1 %vm666_vm0, %v554_v16 }
 0x166   : > { %2840 = vmatmul.mubr.msk.f32.vlgmr.msra.gmra.mrb[2].mxu0 %vm666_vm0, %v549_v4 }
 0x167   : > { %2842 = vmatprep.mubr.msk.f32.mxu0 %vm666_vm0, %v550_v5 }
 0x168   : > { %2821 = vmatmul.mubr.msk.f32.gmra.mrb[6].mxu1 %vm666_vm0, %v555_v18 }
 0x169   : > { %2823 = vmatprep.mubr.msk.f32.mxu1 %vm666_vm0, %v556_v19 }
 0x16a   : > { %2843 = vmatmul.mubr.msk.f32.gmra.mrb[4].mxu0 %vm666_vm0, %v551_v12 }
 0x16b   : > { %2845 = vmatprep.mubr.msk.f32.mxu0 %vm666_vm0, %v552_v14 }
 0x16c   : > { %2824 = vmatmul.mubr.msk.f32.gmra.mrb[8].mxu1 %vm666_vm0, %v557_v20 }
 0x16d   : > { %2826 = vmatprep.mubr.msk.f32.mxu1 %vm666_vm0, %v558_v21 }
 0x16e   : > { %2846 = vmatmul.mubr.msk.f32.gmra.mrb[6].mxu0 %vm666_vm0, %v553_v15 }
 0x16f   : > { %2848 = vmatprep.mubr.msk.f32.mxu0 %vm666_vm0, %v554_v16 }
 0x170   : > { %2827 = vmatmul.mubr.msk.f32.gmra.mrb[10].mxu1 %vm666_vm0, %v559_v22 }
 0x171   : > { %2829 = vmatprep.mubr.msk.f32.mxu1 %vm666_vm0, %v560_v23 }
 0x172   : > { %2849 = vmatmul.mubr.msk.f32.gmra.mrb[8].mxu0 %vm666_vm0, %v555_v18 }
 0x173   : > { %2851 = vmatprep.mubr.msk.f32.mxu0 %vm666_vm0, %v556_v19 }
 0x174   : > { %2830 = vmatmul.mubr.msk.f32.gmra.mrb[12].mxu1 %vm666_vm0, %v561_v24 }
 0x175   : > { %2832 = vmatprep.mubr.msk.f32.mxu1 %vm666_vm0, %v562_v25 }
 0x176   : > { %2852 = vmatmul.mubr.msk.f32.gmra.mrb[10].mxu0 %vm666_vm0, %v557_v20 }
 0x177   : > { %2854 = vmatprep.mubr.msk.f32.mxu0 %vm666_vm0, %v558_v21 }
 0x178   : > { %2833 = vmatmul.mubr.msk.f32.gmra.mrb[14].mxu1 %vm666_vm0, %v563_v26 }
 0x17a   : > { %2855 = vmatmul.mubr.msk.f32.gmra.mrb[12].mxu0 %vm666_vm0, %v559_v22  ;;  %v2504_v22 = vld [vmem:[#allocation15] ss:$0 sm:$0xff] }
 0x17b   : > { %2857 = vmatprep.mubr.msk.f32.mxu0 %vm666_vm0, %v560_v23 }
 0x17e   : > { %2858 = vmatmul.mubr.msk.f32.gmra.mrb[14].mxu0 %vm666_vm0, %v561_v24 }
 0x17f   : > { %2860 = vmatprep.mubr.msk.f32.mxu0 %vm666_vm0, %v562_v25 }
 0x182   : > { %2861 = vmatmul.mubr.msk.f32.gmra.mrb[16].mxu0 %vm666_vm0, %v563_v26 }
 0x22f   : > { %v2813_v31 = vpop.f32.mrb[0].mxu1 }
 0x230   : > { %v787_v32 = vadd.f32 %v2813_v31, %v2487_v30  ;;  %v781_v33 = vpop.f32.mrb[1].mxu1 }
 0x231   : > { %v782_v34 = vadd.f32 %v2487_v30, %v781_v33 }
 0x233   : > { %v3170_v36 = vpack.c.bf16 %v787_v32, %v782_v34  ;;  %v2816_v37 = vpop.f32.mrb[2].mxu1  ;;  %v4851_v38 = vpack.i.bf16 %v787_v32, %v782_v34 }
 0x234   : > { %v797_v39 = vadd.f32 %v2816_v37, %v2487_v30  ;;  %v791_v40 = vpop.f32.mrb[3].mxu1 }
 0x235   : > { %3172 = vmatprep.subr.msk.bf16.mxu1 %vm4847_vm3, %v3170_v36  ;;  %v792_v41 = vadd.f32 %v2487_v30, %v791_v40  ;;  %v2806_v49 = vpop.f32.mrb[0].mxu0 }
 0x236   : > { %3175 = vmatpush3.bf16.xpose.msk.msra.mxu1 %vm4847_vm3, %v3170_v36  ;;  %v648_v50 = vpop.f32.mrb[1].mxu0  ;;  %v4903_v20 = vadd.f32 %v2806_v49, %v2484_v47 }
 0x237   : > { %v3176_v42 = vpack.c.bf16 %v797_v39, %v792_v41  ;;  %v2819_v43 = vpop.f32.mrb[4].mxu1  ;;  %v4857_v44 = vpack.i.bf16 %v797_v39, %v792_v41  ;;  %v4861_v53 = vadd.f32 %v2484_v47, %v648_v50 }
 0x238   : > { %v807_v45 = vadd.f32 %v2819_v43, %v2487_v30  ;;  %v801_v46 = vpop.f32.mrb[5].mxu1 }
 0x239   : > { %3178 = vmatprep.subr.msk.bf16.mxu1 %vm4847_vm3, %v3176_v42  ;;  %v802_v48 = vadd.f32 %v2487_v30, %v801_v46  ;;  %2895 = vmatprep.mubr.msk.f32.mxu1 %vm1018_vm2, %v4861_v53  ;;  %v2841_v21 = vpop.f32.mrb[2].mxu0 }
 0x23a   : > { %v4907_v23 = vadd.f32 %v2841_v21, %v2504_v22  ;;  %v935_v24 = vpop.f32.mrb[3].mxu0 }
 0x23b   : > { %v3182_v51 = vpack.c.bf16 %v807_v45, %v802_v48  ;;  %v2822_v52 = vpop.f32.mrb[6].mxu1  ;;  %v4863_v54 = vpack.i.bf16 %v807_v45, %v802_v48  ;;  %v4909_v25 = vadd.f32 %v2504_v22, %v935_v24 }
 0x23c   : > { %v817_v55 = vadd.f32 %v2822_v52, %v2487_v30  ;;  %v811_v56 = vpop.f32.mrb[7].mxu1  ;;  %v1014_v52 = vlaneseq }
 0x23d   : > { %v812_v57 = vadd.f32 %v2487_v30, %v811_v56  ;;  %v2844_v26 = vpop.f32.mrb[4].mxu0  ;;  %v4332_v56 = vmov -inf  }
 0x23e   : > { %3181 = vmatpush3.bf16.xpose.msk.msra.mxu1 %vm4847_vm3, %v3176_v42  ;;  %v4911_v27 = vadd.f32 %v2844_v26, %v2504_v22  ;;  %v945_v28 = vpop.f32.mrb[5].mxu0 }
 0x23f   : > { %3184 = vmatprep.subr.msk.bf16.mxu1 %vm4847_vm3, %v3182_v51  ;;  %v3188_v58 = vpack.c.bf16 %v817_v55, %v812_v57  ;;  %v2825_v59 = vpop.f32.mrb[8].mxu1  ;;  %v4871_v60 = vpack.i.bf16 %v817_v55, %v812_v57  ;;  %v4913_v29 = vadd.f32 %v2504_v22, %v945_v28  ;;  %v1015_v55 = vand.u32 127, %v1014_v52 }
 0x240   : > { %v827_v61 = vadd.f32 %v2825_v59, %v2487_v30  ;;  %v821_v62 = vpop.f32.mrb[9].mxu1 }
 0x241   : > { %v822_v63 = vadd.f32 %v2487_v30, %v821_v62  ;;  %v2847_v31 = vpop.f32.mrb[6].mxu0  ;;  %v3222_v36 = vpack.c.bf16 %v4911_v27, %v4913_v29  ;;  %vm1016_vm4 = vcmp.lt.s32.totalorder %v1015_v55, 8 }
 0x242   : > { %v4917_v32 = vadd.f32 %v2847_v31, %v2504_v22  ;;  %v955_v33 = vpop.f32.mrb[7].mxu0  ;;  %v4937_v57 = vsel %vm1016_vm4, 0.0, %v4332_v56 }
 0x243   : > { %v3194_v0 = vpack.c.bf16 %v827_v61, %v822_v63  ;;  %v2828_v1 = vpop.f32.mrb[10].mxu1  ;;  %v4873_v2 = vpack.i.bf16 %v827_v61, %v822_v63  ;;  %v4919_v34 = vadd.f32 %v2504_v22, %v955_v33 }
 0x244   : > { %v837_v3 = vadd.f32 %v2828_v1, %v2487_v30  ;;  %v831_v4 = vpop.f32.mrb[11].mxu1 }
 0x245   : > { %v832_v5 = vadd.f32 %v2487_v30, %v831_v4  ;;  %v2850_v37 = vpop.f32.mrb[8].mxu0  ;;  %v3226_v42 = vpack.c.bf16 %v4917_v32, %v4919_v34 }
 0x246   : > { %3187 = vmatpush3.bf16.xpose.msk.msra.mxu1 %vm4847_vm3, %v3182_v51  ;;  %v965_v39 = vpop.f32.mrb[9].mxu0  ;;  %v4923_v40 = vadd.f32 %v2850_v37, %v2504_v22 }
 0x247   : > { %3190 = vmatprep.subr.msk.bf16.mxu1 %vm4847_vm3, %v3188_v58  ;;  %v3200_v6 = vpack.c.bf16 %v837_v3, %v832_v5  ;;  %v2831_v7 = vpop.f32.mrb[12].mxu1  ;;  %v4879_v8 = vpack.i.bf16 %v837_v3, %v832_v5  ;;  %v4925_v41 = vadd.f32 %v2504_v22, %v965_v39 }
 0x248   : > { %v847_v9 = vadd.f32 %v2831_v7, %v2487_v30  ;;  %v841_v10 = vpop.f32.mrb[13].mxu1 }
 0x249   : > { %v842_v11 = vadd.f32 %v2487_v30, %v841_v10  ;;  %v2853_v43 = vpop.f32.mrb[10].mxu0  ;;  %v3230_v50 = vpack.c.bf16 %v4923_v40, %v4925_v41 }
 0x24a   : > { %v975_v45 = vpop.f32.mrb[11].mxu0  ;;  %v4929_v48 = vadd.f32 %v2853_v43, %v2504_v22 }
 0x24b   : > { %v3206_v12 = vpack.c.bf16 %v847_v9, %v842_v11  ;;  %v2834_v13 = vpop.f32.mrb[14].mxu1  ;;  %v4881_v14 = vpack.i.bf16 %v847_v9, %v842_v11  ;;  %v4931_v49 = vadd.f32 %v2504_v22, %v975_v45 }
 0x24c   : > { %v857_v15 = vadd.f32 %v2834_v13, %v2487_v30  ;;  %v851_v16 = vpop.f32.mrb[15].mxu1 }
 0x24d   : > { %v852_v17 = vadd.f32 %v2487_v30, %v851_v16  ;;  %v3218_v30 = vpack.c.bf16 %v4907_v23, %v4909_v25  ;;  %v2856_v46 = vpop.f32.mrb[12].mxu0  ;;  %v3234_v51 = vpack.c.bf16 %v4929_v48, %v4931_v49 }
 0x24e   : > { %3193 = vmatpush3.bf16.xpose.msk.msra.mxu1 %vm4847_vm3, %v3188_v58  ;;  %v985_v47 = vpop.f32.mrb[13].mxu0  ;;  %v4941_v63 = vadd.f32 %v2856_v46, %v2504_v22 }
 0x24f   : > { %3196 = vmatprep.subr.msk.bf16.mxu1 %vm4847_vm3, %v3194_v0  ;;  %v3212_v18 = vpack.c.bf16 %v857_v15, %v852_v17  ;;  %v4887_v19 = vpack.i.bf16 %v857_v15, %v852_v17  ;;  %3219 = vmatprep.subr.bf16.mxu0 %v3218_v30 }
 0x250   : > { %3221 = vmatpush3.bf16.msra.mxu0 %v3218_v30 }
 0x251   : > { %3223 = vmatprep.subr.bf16.mxu0 %v3222_v36  ;;  %v2859_v1 = vpop.f32.mrb[14].mxu0 }
 0x252   : > { %v995_v4 = vpop.f32.mrb[15].mxu0  ;;  %v4947_v5 = vadd.f32 %v2859_v1, %v2504_v22 }
 0x254   : > { %3225 = vmatpush3.bf16.msra.mxu0 %v3222_v36 }
 0x255   : > { %3227 = vmatprep.subr.bf16.mxu0 %v3226_v42  ;;  %v2862_v7 = vpop.f32.mrb[16].mxu0 }
 0x256   : > { %3199 = vmatpush3.bf16.xpose.msk.msra.mxu1 %vm4847_vm3, %v3194_v0  ;;  %v4943_v0 = vadd.f32 %v2504_v22, %v985_v47  ;;  %v1005_v10 = vpop.f32.mrb[17].mxu0  ;;  %v4953_v11 = vadd.f32 %v2862_v7, %v2504_v22 }
 0x257   : > { %3202 = vmatprep.subr.msk.bf16.mxu1 %vm4847_vm3, %v3200_v6 }
 0x258   : > { %3229 = vmatpush3.bf16.msra.mxu0 %v3226_v42  ;;  %v3238_v3 = vpack.c.bf16 %v4941_v63, %v4943_v0 }
 0x259   : > { %3231 = vmatprep.subr.bf16.mxu0 %v3230_v50 }
 0x25c   : > { %3233 = vmatpush3.bf16.msra.mxu0 %v3230_v50 }
 0x25d   : > { %3235 = vmatprep.subr.bf16.mxu0 %v3234_v51 }
 0x25e   : > { %3205 = vmatpush3.bf16.xpose.msk.msra.mxu1 %vm4847_vm3, %v3200_v6  ;;  %v4949_v6 = vadd.f32 %v2504_v22, %v995_v4 }
 0x25f   : > { %3208 = vmatprep.subr.msk.bf16.mxu1 %vm4847_vm3, %v3206_v12 }
 0x260   : > { %3237 = vmatpush3.bf16.msra.mxu0 %v3234_v51  ;;  %v3242_v9 = vpack.c.bf16 %v4947_v5, %v4949_v6 }
 0x261   : > { %3239 = vmatprep.subr.bf16.mxu0 %v3238_v3 }
 0x264   : > { %3241 = vmatpush3.bf16.msra.mxu0 %v3238_v3 }
 0x265   : > { %3243 = vmatprep.subr.bf16.mxu0 %v3242_v9 }
 0x266   : > { %3211 = vmatpush3.bf16.xpose.msk.msra.mxu1 %vm4847_vm3, %v3206_v12  ;;  %v4955_v12 = vadd.f32 %v2504_v22, %v1005_v10 }
 0x267   : > { %3214 = vmatprep.subr.msk.bf16.mxu1 %vm4847_vm3, %v3212_v18 }
 0x268   : > { %3245 = vmatpush3.bf16.msra.mxu0 %v3242_v9  ;;  %v3246_v13 = vpack.c.bf16 %v4953_v11, %v4955_v12 }
 0x26a   : > { %3247 = vmatprep.subr.bf16.mxu0 %v3246_v13 }
 0x26c   : > { %3249 = vmatpush3.bf16.msra.mxu0 %v3246_v13 }
 0x26e   : > { %3217 = vmatpush3.bf16.xpose.msk.msra.mxu1 %vm4847_vm3, %v3212_v18 }
 0x275   : > { %2896 = vmatmul.mubr.msk.f32.vlgmr.msra.gmra.mrb[16].mxu1 %vm1018_vm2, %v4903_v20 }
 0x348   : > { %v2897_v58 = vpop.f32.mrb[16].mxu1 }
 0x349   : > { %v1139_v59 = vpop.f32.mrb[17].mxu1  ;;  %v1145_v62 = vadd.f32 %v2897_v58, %v4937_v57 }
 0x34a   : > { %v1140_v61 = vadd.f32 %v1139_v59, %v4937_v57 }
 0x34c   : > { %1148 = vmax.xlane.f32.xlu0 %v1140_v61 }
 0x350   : > { %1150 = vmax.xlane.f32.xlu0 %v1145_v62 }
 0x366   : > { %3657 = vrot.lane.b32.xlu0 %v4851_v38, %s4333_s19 }
 0x36a   : > { %3677 = vrot.lane.b32.xlu0 %v4873_v2, %s4333_s19 }
 0x36e   : > { %3687 = vrot.lane.b32.xlu0 %v4881_v14, %s4333_s19 }
 0x372   : > { %1243 = vrot.lane.b32.xlu0 %v4861_v53, %s4333_s19 }
 0x3d9   : > { %v1149_v15 = vpop.xlane.xlu0 %1148 }
 0x3da   : > { %v1152_v17 = vsub.f32 %v1140_v61, %v1149_v15 }
 0x3dc   : > { %v1154_v24 = vmul.f32 1.442695, %v1152_v17 }
 0x3dd   : > { %v1151_v16 = vpop.xlane.xlu0 %1150 }
 0x3de   : > { %v1153_v18 = vsub.f32 %v1145_v62, %v1151_v16 }
 0x3e0   : > { %v1156_v21 = vmul.f32 1.442695, %v1153_v18 }
 0x3e1   : > { %v3658_v22 = vpop.permute.xlu0 %3657 }
 0x3e2   : > { %3896 = vpow2.f32 %v1156_v21  ;;  %v3660_v26 = vunpack.i.h.bf16 %v3658_v22  ;;  %v3659_v28 = vunpack.i.l.bf16 %v3658_v22 }
 0x3e3   : > { %3898 = vpow2.f32 %v1154_v24 }
 0x3e4   : > { %v3250_v30 = vpack.c.bf16 %v3660_v26, %v3659_v28 }
 0x3e5   : > { %v3678_v39 = vpop.permute.xlu0 %3677 }
 0x3e6   : > { %3252 = vmatprep.subr.msk.bf16.mxu0 %vm4847_vm3, %v3250_v30  ;;  %v3680_v9 = vunpack.i.h.bf16 %v3678_v39  ;;  %v3679_v10 = vunpack.i.l.bf16 %v3678_v39 }
 0x3e8   : > { %v3274_v13 = vpack.c.bf16 %v3680_v9, %v3679_v10 }
 0x3e9   : > { %v3688_v43 = vpop.permute.xlu0 %3687 }
 0x3ea   : > { %v3690_v21 = vunpack.i.h.bf16 %v3688_v43  ;;  %v3689_v22 = vunpack.i.l.bf16 %v3688_v43 }
 0x3ec   : > { %v3897_v31 = vpop.eup %3896  ;;  %v3286_v24 = vpack.c.bf16 %v3690_v21, %v3689_v22 }
 0x3ed   : > { %1160 = vadd.xlane.f32.xlu1 %v3897_v31  ;;  %v3899_v33 = vpop.eup %3898  ;;  %v1244_v55 = vpop.permute.xlu0 %1243 }
 0x3f1   : > { %1158 = vadd.xlane.f32.xlu1 %v3899_v33 }
 0x402   : > { %3662 = vrot.lane.b32.xlu1 %v4857_v44, %s4333_s19 }
 0x406   : > { %3667 = vrot.lane.b32.xlu1 %v4863_v54, %s4333_s19 }
 0x40a   : > { %3672 = vrot.lane.b32.xlu1 %v4871_v60, %s4333_s19 }
 0x40e   : > { %3682 = vrot.lane.b32.xlu1 %v4879_v8, %s4333_s19 }
 0x412   : > { %3692 = vrot.lane.b32.xlu1 %v4887_v19, %s4333_s19 }
 0x416   : > { %1245 = vrot.lane.b32.xlu1 %v4903_v20, %s4333_s19 }
 0x47a   : > { %v1161_v36 = vpop.xlane.xlu1 %1160 }
 0x47b   : > { %3900 = vrcp.f32 %v1161_v36 }
 0x47e   : > { %v1159_v37 = vpop.xlane.xlu1 %1158 }
 0x47f   : > { %3902 = vrcp.f32 %v1159_v37 }
 0x482   : > { %v3663_v42 = vpop.permute.xlu1 %3662 }
 0x483   : > { %v3665_v47 = vunpack.i.h.bf16 %v3663_v42  ;;  %v3664_v50 = vunpack.i.l.bf16 %v3663_v42 }
 0x485   : > { %v3901_v45 = vpop.eup %3900  ;;  %v3256_v56 = vpack.c.bf16 %v3665_v47, %v3664_v50  ;;  %v5025_v47 = vpack.i.bf16 %v4941_v63, %v4943_v0  ;;  %v5031_v50 = vpack.i.bf16 %v4907_v23, %v4909_v25  ;;  %v5049_v23 = vpack.i.bf16 %v4953_v11, %v4955_v12 }
 0x486   : > { %v1165_v52 = vmul.f32 %v3901_v45, %v3897_v31  ;;  %v3668_v58 = vpop.permute.xlu1 %3667  ;;  %v5055_v25 = vpack.i.bf16 %v4923_v40, %v4925_v41 }
 0x487   : > { %v3670_v59 = vunpack.i.h.bf16 %v3668_v58  ;;  %v3669_v61 = vunpack.i.l.bf16 %v3668_v58 }
 0x489   : > { %v3903_v46 = vpop.eup %3902  ;;  %v3262_v62 = vpack.c.bf16 %v3670_v59, %v3669_v61 }
 0x48a   : > { %v1164_v51 = vmul.f32 %v3903_v46, %v3899_v33  ;;  %v3673_v1 = vpop.permute.xlu1 %3672  ;;  %v5019_v46 = vpack.i.bf16 %v4911_v27, %v4913_v29  ;;  %v5037_v27 = vpack.i.bf16 %v4947_v5, %v4949_v6  ;;  %v5043_v29 = vpack.i.bf16 %v4917_v32, %v4919_v34 }
 0x48b   : > { %v3675_v3 = vunpack.i.h.bf16 %v3673_v1  ;;  %v3674_v4 = vunpack.i.l.bf16 %v3673_v1  ;;  %v5061_v32 = vpack.i.bf16 %v4929_v48, %v4931_v49 }
 0x48c   : > { %2930 = vmatprep.mubr.f32.mxu0 %v1164_v51 }
 0x48d   : > { %2931 = vmatmul.mubr.f32.vlgmr.msra.gmra.mrb[18].mxu0 %v1165_v52  ;;  %v3268_v7 = vpack.c.bf16 %v3675_v3, %v3674_v4 }
 0x48e   : > { %3255 = vmatpush3.bf16.xpose.msk.msra.mxu0 %vm4847_vm3, %v3250_v30  ;;  %2965 = vmatprep.mubr.msk.f32.mxu0 %vm1018_vm2, %v1244_v55  ;;  %v3683_v15 = vpop.permute.xlu1 %3682 }
 0x48f   : > { %3258 = vmatprep.subr.msk.bf16.mxu0 %vm4847_vm3, %v3256_v56  ;;  %v3685_v16 = vunpack.i.h.bf16 %v3683_v15  ;;  %v3684_v17 = vunpack.i.l.bf16 %v3683_v15 }
 0x491   : > { %v3280_v18 = vpack.c.bf16 %v3685_v16, %v3684_v17 }
 0x492   : > { %v3693_v26 = vpop.permute.xlu1 %3692 }
 0x493   : > { %v3695_v28 = vunpack.i.h.bf16 %v3693_v26  ;;  %v3694_v30 = vunpack.i.l.bf16 %v3693_v26 }
 0x495   : > { %v3292_v31 = vpack.c.bf16 %v3695_v28, %v3694_v30 }
 0x496   : > { %3261 = vmatpush3.bf16.xpose.msk.msra.mxu0 %vm4847_vm3, %v3256_v56  ;;  %v1246_v33 = vpop.permute.xlu1 %1245 }
 0x497   : > { %3264 = vmatprep.subr.msk.bf16.mxu0 %vm4847_vm3, %v3262_v62 }
 0x49e   : > { %3267 = vmatpush3.bf16.xpose.msk.msra.mxu0 %vm4847_vm3, %v3262_v62 }
 0x49f   : > { %3270 = vmatprep.subr.msk.bf16.mxu0 %vm4847_vm3, %v3268_v7 }
 0x4a6   : > { %3273 = vmatpush3.bf16.xpose.msk.msra.mxu0 %vm4847_vm3, %v3268_v7 }
 0x4a7   : > { %3276 = vmatprep.subr.msk.bf16.mxu0 %vm4847_vm3, %v3274_v13 }
 0x4ae   : > { %3279 = vmatpush3.bf16.xpose.msk.msra.mxu0 %vm4847_vm3, %v3274_v13 }
 0x4af   : > { %3282 = vmatprep.subr.msk.bf16.mxu0 %vm4847_vm3, %v3280_v18 }
 0x4b6   : > { %3285 = vmatpush3.bf16.xpose.msk.msra.mxu0 %vm4847_vm3, %v3280_v18 }
 0x4b7   : > { %3288 = vmatprep.subr.msk.bf16.mxu0 %vm4847_vm3, %v3286_v24 }
 0x4be   : > { %3291 = vmatpush3.bf16.xpose.msk.msra.mxu0 %vm4847_vm3, %v3286_v24 }
 0x4bf   : > { %3294 = vmatprep.subr.msk.bf16.mxu0 %vm4847_vm3, %v3292_v31 }
 0x4c6   : > { %3297 = vmatpush3.bf16.xpose.msk.msra.mxu0 %vm4847_vm3, %v3292_v31 }
 0x4cd   : > { %2966 = vmatmul.mubr.msk.f32.vlgmr.msra.gmra.mrb[20].mxu0 %vm1018_vm2, %v1246_v33 }
 0x560   : > { %v2932_v36 = vpop.f32.mrb[18].mxu0 }
 0x561   : > { %1242 = vst.msk [vmem:[#allocation2 + $0x8] sm:$0xff] %vm1018_vm2, %v2932_v36  ;;  %v1232_v37 = vpop.f32.mrb[19].mxu0 }
 0x562   : > { %1241 = vst.msk [vmem:[#allocation2] sm:$0xff] %vm1018_vm2, %v1232_v37 }
 0x5a0   : > { %v2967_v39 = vpop.f32.mrb[20].mxu0 }
 0x5a1   : > { %v1387_v42 = vadd.f32 %v2967_v39, %v4937_v57  ;;  %v1381_v43 = vpop.f32.mrb[21].mxu0 }
 0x5a2   : > { %v1382_v45 = vadd.f32 %v1381_v43, %v4937_v57 }
 0x5a3   : > { %1392 = vmax.xlane.f32.xlu1 %v1387_v42 }
 0x5a4   : > { %1390 = vmax.xlane.f32.xlu0 %v1382_v45 }
 0x5b4   : > { %3702 = vrot.lane.b32.xlu1 %v5019_v46, %s4333_s19 }
 0x5b8   : > { %3722 = vrot.lane.b32.xlu1 %v5025_v47, %s4333_s19 }
 0x5ba   : > { %3697 = vrot.lane.b32.xlu0 %v5031_v50, %s4333_s19 }
 0x5bc   : > { %3727 = vrot.lane.b32.xlu1 %v5037_v27, %s4333_s19 }
 0x5be   : > { %3707 = vrot.lane.b32.xlu0 %v5043_v29, %s4333_s19 }
 0x5c0   : > { %3732 = vrot.lane.b32.xlu1 %v5049_v23, %s4333_s19 }
 0x5c2   : > { %3712 = vrot.lane.b32.xlu0 %v5055_v25, %s4333_s19 }
 0x5c6   : > { %3717 = vrot.lane.b32.xlu0 %v5061_v32, %s4333_s19  ;;  %s4218_s19 = scalar_lea.vmem %s4217_s16, 512 }
 0x5c7   : > { %p4220_p12 = scmp.lt.s32.totalorder %s4218_s19, %s4212_s6 }
 0x5c9   : > { %p4221_p8 = por %p4220_p12, %p4219_p10 }
 0x5cb   : > { %p4222_p3 = pnand %p4221_p8, %p4215_p1 }
 0x630   : > { %v1393_v34 = vpop.xlane.xlu1 %1392 }
 0x631   : > { %v1395_v63 = vsub.f32 %v1387_v42, %v1393_v34  ;;  %v1391_v0 = vpop.xlane.xlu0 %1390 }
 0x632   : > { %v1394_v5 = vsub.f32 %v1382_v45, %v1391_v0 }
 0x633   : > { %v1398_v6 = vmul.f32 1.442695, %v1395_v63 }
 0x634   : > { %v1396_v11 = vmul.f32 1.442695, %v1394_v5  ;;  %v3703_v12 = vpop.permute.xlu1 %3702 }
 0x635   : > { %3904 = vpow2.f32 %v1398_v6  ;;  %v3705_v40 = vunpack.i.h.bf16 %v3703_v12  ;;  %v3698_v41 = vpop.permute.xlu0 %3697  ;;  %v3704_v51 = vunpack.i.l.bf16 %v3703_v12 }
 0x636   : > { %3906 = vpow2.f32 %v1396_v11  ;;  %v3700_v52 = vunpack.i.h.bf16 %v3698_v41  ;;  %v3699_v55 = vunpack.i.l.bf16 %v3698_v41 }
 0x637   : > { %v3302_v49 = vpack.c.bf16 %v3705_v40, %v3704_v51 }
 0x638   : > { %v3298_v56 = vpack.c.bf16 %v3700_v52, %v3699_v55  ;;  %v3723_v7 = vpop.permute.xlu1 %3722 }
 0x639   : > { %v3708_v48 = vpop.permute.xlu0 %3707  ;;  %v3725_v18 = vunpack.i.h.bf16 %v3723_v7  ;;  %v3724_v21 = vunpack.i.l.bf16 %v3723_v7 }
 0x63a   : > { %v3710_v58 = vunpack.i.h.bf16 %v3708_v48  ;;  %v3709_v59 = vunpack.i.l.bf16 %v3708_v48  ;;  %3299 = vmatprep.subr.bf16.mxu1 %v3298_v56 }
 0x63b   : > { %3301 = vmatpush3.bf16.msra.mxu1 %v3298_v56  ;;  %v3318_v24 = vpack.c.bf16 %v3725_v18, %v3724_v21 }
 0x63c   : > { %3303 = vmatprep.subr.bf16.mxu1 %v3302_v49  ;;  %v3306_v62 = vpack.c.bf16 %v3710_v58, %v3709_v59  ;;  %v3728_v17 = vpop.permute.xlu1 %3727 }
 0x63d   : > { %v3713_v61 = vpop.permute.xlu0 %3712  ;;  %v3730_v26 = vunpack.i.h.bf16 %v3728_v17  ;;  %v3729_v28 = vunpack.i.l.bf16 %v3728_v17 }
 0x63e   : > { %v3715_v1 = vunpack.i.h.bf16 %v3713_v61  ;;  %v3714_v3 = vunpack.i.l.bf16 %v3713_v61 }
 0x63f   : > { %v3905_v4 = vpop.eup %3904  ;;  %3305 = vmatpush3.bf16.msra.mxu1 %v3302_v49  ;;  %v3322_v31 = vpack.c.bf16 %v3730_v26, %v3729_v28 }
 0x640   : > { %v3907_v9 = vpop.eup %3906  ;;  %1402 = vadd.xlane.f32.xlu0 %v3905_v4  ;;  %3307 = vmatprep.subr.bf16.mxu1 %v3306_v62  ;;  %v3310_v13 = vpack.c.bf16 %v3715_v1, %v3714_v3  ;;  %v3733_v30 = vpop.permute.xlu1 %3732 }
 0x641   : > { %1400 = vadd.xlane.f32.xlu1 %v3907_v9  ;;  %v3718_v10 = vpop.permute.xlu0 %3717  ;;  %v3735_v33 = vunpack.i.h.bf16 %v3733_v30  ;;  %v3734_v36 = vunpack.i.l.bf16 %v3733_v30 }
 0x642   : > { %v3720_v15 = vunpack.i.h.bf16 %v3718_v10  ;;  %v3719_v16 = vunpack.i.l.bf16 %v3718_v10 }
 0x643   : > { %3309 = vmatpush3.bf16.msra.mxu1 %v3306_v62  ;;  %v3326_v37 = vpack.c.bf16 %v3735_v33, %v3734_v36 }
 0x644   : > { %3311 = vmatprep.subr.bf16.mxu1 %v3310_v13  ;;  %v3314_v22 = vpack.c.bf16 %v3720_v15, %v3719_v16 }
 0x647   : > { %3313 = vmatpush3.bf16.msra.mxu1 %v3310_v13 }
 0x648   : > { %3315 = vmatprep.subr.bf16.mxu1 %v3314_v22 }
 0x64b   : > { %3317 = vmatpush3.bf16.msra.mxu1 %v3314_v22 }
 0x64c   : > { %3319 = vmatprep.subr.bf16.mxu1 %v3318_v24 }
 0x64f   : > { %3321 = vmatpush3.bf16.msra.mxu1 %v3318_v24 }
 0x650   : > { %3323 = vmatprep.subr.bf16.mxu1 %v3322_v31 }
 0x652   : > { %3742 = vrot.lane.b32.xlu1 %v4857_v44, %s4334_s26 }
 0x653   : > { %3325 = vmatpush3.bf16.msra.mxu1 %v3322_v31 }
 0x654   : > { %3327 = vmatprep.subr.bf16.mxu1 %v3326_v37 }
 0x656   : > { %3737 = vrot.lane.b32.xlu0 %v4851_v38, %s4334_s26  ;;  %3752 = vrot.lane.b32.xlu1 %v4871_v60, %s4334_s26 }
 0x657   : > { %3329 = vmatpush3.bf16.msra.mxu1 %v3326_v37 }
 0x65a   : > { %3747 = vrot.lane.b32.xlu0 %v4863_v54, %s4334_s26  ;;  %3762 = vrot.lane.b32.xlu1 %v4879_v8, %s4334_s26 }
 0x65e   : > { %3757 = vrot.lane.b32.xlu0 %v4873_v2, %s4334_s26  ;;  %3772 = vrot.lane.b32.xlu1 %v4887_v19, %s4334_s26 }
 0x662   : > { %3767 = vrot.lane.b32.xlu0 %v4881_v14, %s4334_s26  ;;  %1560 = vrot.lane.b32.xlu1 %v4903_v20, %s4334_s26 }
 0x666   : > { %1558 = vrot.lane.b32.xlu0 %v4861_v53, %s4334_s26 }
 0x6cd   : > { %v1403_v39 = vpop.xlane.xlu0 %1402 }
 0x6ce   : > { %3908 = vrcp.f32 %v1403_v39  ;;  %v1401_v42 = vpop.xlane.xlu1 %1400 }
 0x6cf   : > { %3910 = vrcp.f32 %v1401_v42 }
 0x6d1   : > { %v3738_v43 = vpop.permute.xlu0 %3737 }
 0x6d2   : > { %v3740_v45 = vunpack.i.h.bf16 %v3738_v43  ;;  %v3739_v34 = vunpack.i.l.bf16 %v3738_v43  ;;  %v3743_v5 = vpop.permute.xlu1 %3742 }
 0x6d3   : > { %v3745_v12 = vunpack.i.h.bf16 %v3743_v5  ;;  %v3744_v40 = vunpack.i.l.bf16 %v3743_v5 }
 0x6d4   : > { %v3330_v63 = vpack.c.bf16 %v3740_v45, %v3739_v34 }
 0x6d5   : > { %v3748_v0 = vpop.permute.xlu0 %3747  ;;  %v3336_v55 = vpack.c.bf16 %v3745_v12, %v3744_v40 }
 0x6d6   : > { %3332 = vmatprep.subr.msk.bf16.mxu1 %vm4847_vm3, %v3330_v63  ;;  %v3750_v48 = vunpack.i.h.bf16 %v3748_v0  ;;  %v3749_v49 = vunpack.i.l.bf16 %v3748_v0  ;;  %v3753_v61 = vpop.permute.xlu1 %3752 }
 0x6d7   : > { %v3755_v62 = vunpack.i.h.bf16 %v3753_v61  ;;  %v3754_v1 = vunpack.i.l.bf16 %v3753_v61 }
 0x6d8   : > { %v3909_v6 = vpop.eup %3908  ;;  %v3342_v59 = vpack.c.bf16 %v3750_v48, %v3749_v49 }
 0x6d9   : > { %v3911_v11 = vpop.eup %3910  ;;  %v3758_v41 = vpop.permute.xlu0 %3757  ;;  %v1407_v52 = vmul.f32 %v3909_v6, %v3905_v4  ;;  %v3348_v3 = vpack.c.bf16 %v3755_v62, %v3754_v1 }
 0x6da   : > { %v1406_v51 = vmul.f32 %v3911_v11, %v3907_v9  ;;  %v3760_v4 = vunpack.i.h.bf16 %v3758_v41  ;;  %v3759_v7 = vunpack.i.l.bf16 %v3758_v41  ;;  %v3763_v10 = vpop.permute.xlu1 %3762 }
 0x6db   : > { %v3765_v13 = vunpack.i.h.bf16 %v3763_v10  ;;  %v3764_v15 = vunpack.i.l.bf16 %v3763_v10 }
 0x6dc   : > { %3000 = vmatprep.mubr.f32.mxu1 %v1406_v51  ;;  %v3354_v9 = vpack.c.bf16 %v3760_v4, %v3759_v7 }
 0x6dd   : > { %v3768_v56 = vpop.permute.xlu0 %3767  ;;  %3001 = vmatmul.mubr.f32.vlgmr.msra.gmra.mrb[18].mxu1 %v1407_v52  ;;  %v3360_v16 = vpack.c.bf16 %v3765_v13, %v3764_v15 }
 0x6de   : > { %3335 = vmatpush3.bf16.xpose.msk.msra.mxu1 %vm4847_vm3, %v3330_v63  ;;  %v3770_v17 = vunpack.i.h.bf16 %v3768_v56  ;;  %v3769_v18 = vunpack.i.l.bf16 %v3768_v56  ;;  %v3773_v22 = vpop.permute.xlu1 %3772 }
 0x6df   : > { %3338 = vmatprep.subr.msk.bf16.mxu1 %vm4847_vm3, %v3336_v55  ;;  %v3775_v24 = vunpack.i.h.bf16 %v3773_v22  ;;  %v3774_v26 = vunpack.i.l.bf16 %v3773_v22 }
 0x6e0   : > { %v3366_v21 = vpack.c.bf16 %v3770_v17, %v3769_v18 }
 0x6e1   : > { %v1559_v58 = vpop.permute.xlu0 %1558  ;;  %v3372_v28 = vpack.c.bf16 %v3775_v24, %v3774_v26 }
 0x6e2   : > { %3035 = vmatprep.mubr.msk.f32.mxu1 %vm1018_vm2, %v1559_v58  ;;  %v1561_v30 = vpop.permute.xlu1 %1560 }
 0x6e6   : > { %3341 = vmatpush3.bf16.xpose.msk.msra.mxu1 %vm4847_vm3, %v3336_v55 }
 0x6e7   : > { %3344 = vmatprep.subr.msk.bf16.mxu1 %vm4847_vm3, %v3342_v59 }
 0x6ee   : > { %3347 = vmatpush3.bf16.xpose.msk.msra.mxu1 %vm4847_vm3, %v3342_v59 }
 0x6ef   : > { %3350 = vmatprep.subr.msk.bf16.mxu1 %vm4847_vm3, %v3348_v3 }
 0x6f6   : > { %3353 = vmatpush3.bf16.xpose.msk.msra.mxu1 %vm4847_vm3, %v3348_v3 }
 0x6f7   : > { %3356 = vmatprep.subr.msk.bf16.mxu1 %vm4847_vm3, %v3354_v9 }
 0x6fe   : > { %3359 = vmatpush3.bf16.xpose.msk.msra.mxu1 %vm4847_vm3, %v3354_v9 }
 0x6ff   : > { %3362 = vmatprep.subr.msk.bf16.mxu1 %vm4847_vm3, %v3360_v16 }
 0x706   : > { %3365 = vmatpush3.bf16.xpose.msk.msra.mxu1 %vm4847_vm3, %v3360_v16 }
 0x707   : > { %3368 = vmatprep.subr.msk.bf16.mxu1 %vm4847_vm3, %v3366_v21 }
 0x70e   : > { %3371 = vmatpush3.bf16.xpose.msk.msra.mxu1 %vm4847_vm3, %v3366_v21 }
 0x70f   : > { %3374 = vmatprep.subr.msk.bf16.mxu1 %vm4847_vm3, %v3372_v28 }
 0x716   : > { %3377 = vmatpush3.bf16.xpose.msk.msra.mxu1 %vm4847_vm3, %v3372_v28 }
 0x71d   : > { %3036 = vmatmul.mubr.msk.f32.vlgmr.msra.gmra.mrb[20].mxu1 %vm1018_vm2, %v1561_v30 }
 0x7b0   : > { %v5119_v31 = vpop.f32.mrb[18].mxu1 }
 0x7b1   : > { %v5121_v33 = vpop.f32.mrb[19].mxu1 }
 0x7f0   : > { %v3037_v36 = vpop.f32.mrb[20].mxu1 }
 0x7f1   : > { %v1702_v37 = vadd.f32 %v3037_v36, %v4937_v57  ;;  %v1696_v39 = vpop.f32.mrb[21].mxu1 }
 0x7f2   : > { %v1697_v42 = vadd.f32 %v1696_v39, %v4937_v57 }
 0x7f3   : > { %1707 = vmax.xlane.f32.xlu1 %v1702_v37 }
 0x7f4   : > { %1705 = vmax.xlane.f32.xlu0 %v1697_v42 }
 0x804   : > { %3782 = vrot.lane.b32.xlu1 %v5019_v46, %s4334_s26 }
 0x808   : > { %3802 = vrot.lane.b32.xlu1 %v5025_v47, %s4334_s26 }
 0x80a   : > { %3777 = vrot.lane.b32.xlu0 %v5031_v50, %s4334_s26 }
 0x80c   : > { %3807 = vrot.lane.b32.xlu1 %v5037_v27, %s4334_s26 }
 0x80e   : > { %3787 = vrot.lane.b32.xlu0 %v5043_v29, %s4334_s26 }
 0x810   : > { %3812 = vrot.lane.b32.xlu1 %v5049_v23, %s4334_s26 }
 0x812   : > { %3792 = vrot.lane.b32.xlu0 %v5055_v25, %s4334_s26 }
 0x816   : > { %3797 = vrot.lane.b32.xlu0 %v5061_v32, %s4334_s26 }
 0x880   : > { %v1708_v43 = vpop.xlane.xlu1 %1707 }
 0x881   : > { %v1710_v45 = vsub.f32 %v1702_v37, %v1708_v43  ;;  %v1706_v34 = vpop.xlane.xlu0 %1705 }
 0x882   : > { %v1709_v63 = vsub.f32 %v1697_v42, %v1706_v34 }
 0x883   : > { %v1713_v0 = vmul.f32 1.442695, %v1710_v45 }
 0x884   : > { %v1711_v5 = vmul.f32 1.442695, %v1709_v63  ;;  %v3783_v6 = vpop.permute.xlu1 %3782 }
 0x885   : > { %3912 = vpow2.f32 %v1713_v0  ;;  %v3785_v11 = vunpack.i.h.bf16 %v3783_v6  ;;  %v3778_v12 = vpop.permute.xlu0 %3777  ;;  %v3784_v40 = vunpack.i.l.bf16 %v3783_v6 }
 0x886   : > { %3914 = vpow2.f32 %v1711_v5  ;;  %v3780_v41 = vunpack.i.h.bf16 %v3778_v12  ;;  %v3779_v51 = vunpack.i.l.bf16 %v3778_v12 }
 0x887   : > { %v3382_v56 = vpack.c.bf16 %v3785_v11, %v3784_v40 }
 0x888   : > { %v3378_v52 = vpack.c.bf16 %v3780_v41, %v3779_v51  ;;  %v3803_v3 = vpop.permute.xlu1 %3802 }
 0x889   : > { %v3788_v55 = vpop.permute.xlu0 %3787  ;;  %v3805_v16 = vunpack.i.h.bf16 %v3803_v3  ;;  %v3804_v17 = vunpack.i.l.bf16 %v3803_v3 }
 0x88a   : > { %v3790_v48 = vunpack.i.h.bf16 %v3788_v55  ;;  %v3789_v49 = vunpack.i.l.bf16 %v3788_v55  ;;  %3379 = vmatprep.subr.bf16.mxu0 %v3378_v52 }
 0x88b   : > { %3381 = vmatpush3.bf16.msra.mxu0 %v3378_v52  ;;  %v3398_v21 = vpack.c.bf16 %v3805_v16, %v3804_v17 }
 0x88c   : > { %3383 = vmatprep.subr.bf16.mxu0 %v3382_v56  ;;  %v3386_v59 = vpack.c.bf16 %v3790_v48, %v3789_v49  ;;  %v3808_v15 = vpop.permute.xlu1 %3807 }
 0x88d   : > { %v3793_v58 = vpop.permute.xlu0 %3792  ;;  %v3810_v22 = vunpack.i.h.bf16 %v3808_v15  ;;  %v3809_v24 = vunpack.i.l.bf16 %v3808_v15 }
 0x88e   : > { %v3795_v61 = vunpack.i.h.bf16 %v3793_v58  ;;  %v3794_v62 = vunpack.i.l.bf16 %v3793_v58 }
 0x88f   : > { %v3913_v1 = vpop.eup %3912  ;;  %3385 = vmatpush3.bf16.msra.mxu0 %v3382_v56  ;;  %v3402_v28 = vpack.c.bf16 %v3810_v22, %v3809_v24 }
 0x890   : > { %v3915_v4 = vpop.eup %3914  ;;  %1717 = vadd.xlane.f32.xlu0 %v3913_v1  ;;  %3387 = vmatprep.subr.bf16.mxu0 %v3386_v59  ;;  %v3390_v9 = vpack.c.bf16 %v3795_v61, %v3794_v62  ;;  %v3813_v26 = vpop.permute.xlu1 %3812 }
 0x891   : > { %1715 = vadd.xlane.f32.xlu1 %v3915_v4  ;;  %v3798_v7 = vpop.permute.xlu0 %3797  ;;  %v3815_v30 = vunpack.i.h.bf16 %v3813_v26  ;;  %v3814_v36 = vunpack.i.l.bf16 %v3813_v26 }
 0x892   : > { %v3800_v10 = vunpack.i.h.bf16 %v3798_v7  ;;  %v3799_v13 = vunpack.i.l.bf16 %v3798_v7 }
 0x893   : > { %3389 = vmatpush3.bf16.msra.mxu0 %v3386_v59  ;;  %v3406_v37 = vpack.c.bf16 %v3815_v30, %v3814_v36 }
 0x894   : > { %3391 = vmatprep.subr.bf16.mxu0 %v3390_v9  ;;  %v3394_v18 = vpack.c.bf16 %v3800_v10, %v3799_v13 }
 0x897   : > { %3393 = vmatpush3.bf16.msra.mxu0 %v3390_v9 }
 0x898   : > { %3395 = vmatprep.subr.bf16.mxu0 %v3394_v18 }
 0x89b   : > { %3397 = vmatpush3.bf16.msra.mxu0 %v3394_v18 }
 0x89c   : > { %3399 = vmatprep.subr.bf16.mxu0 %v3398_v21 }
 0x89f   : > { %3401 = vmatpush3.bf16.msra.mxu0 %v3398_v21 }
 0x8a0   : > { %3403 = vmatprep.subr.bf16.mxu0 %v3402_v28 }
 0x8a2   : > { %3822 = vrot.lane.b32.xlu1 %v4857_v44, %s4335_s29 }
 0x8a3   : > { %3405 = vmatpush3.bf16.msra.mxu0 %v3402_v28 }
 0x8a4   : > { %3407 = vmatprep.subr.bf16.mxu0 %v3406_v37 }
 0x8a6   : > { %3817 = vrot.lane.b32.xlu0 %v4851_v38, %s4335_s29  ;;  %3832 = vrot.lane.b32.xlu1 %v4871_v60, %s4335_s29 }
 0x8a7   : > { %3409 = vmatpush3.bf16.msra.mxu0 %v3406_v37 }
 0x8aa   : > { %3827 = vrot.lane.b32.xlu0 %v4863_v54, %s4335_s29  ;;  %3842 = vrot.lane.b32.xlu1 %v4879_v8, %s4335_s29 }
 0x8ae   : > { %3837 = vrot.lane.b32.xlu0 %v4873_v2, %s4335_s29  ;;  %3852 = vrot.lane.b32.xlu1 %v4887_v19, %s4335_s29 }
 0x8b2   : > { %3847 = vrot.lane.b32.xlu0 %v4881_v14, %s4335_s29  ;;  %1859 = vrot.lane.b32.xlu1 %v4903_v20, %s4335_s29 }
 0x8b6   : > { %1857 = vrot.lane.b32.xlu0 %v4861_v53, %s4335_s29 }
 0x91d   : > { %v1718_v38 = vpop.xlane.xlu0 %1717 }
 0x91e   : > { %3916 = vrcp.f32 %v1718_v38  ;;  %v1716_v44 = vpop.xlane.xlu1 %1715 }
 0x91f   : > { %3918 = vrcp.f32 %v1716_v44 }
 0x921   : > { %v3818_v54 = vpop.permute.xlu0 %3817 }
 0x922   : > { %v3820_v60 = vunpack.i.h.bf16 %v3818_v54  ;;  %v3819_v8 = vunpack.i.l.bf16 %v3818_v54  ;;  %v3823_v42 = vpop.permute.xlu1 %3822 }
 0x923   : > { %v3825_v43 = vunpack.i.h.bf16 %v3823_v42  ;;  %v3824_v20 = vunpack.i.l.bf16 %v3823_v42 }
 0x924   : > { %v3410_v2 = vpack.c.bf16 %v3820_v60, %v3819_v8 }
 0x925   : > { %v3828_v39 = vpop.permute.xlu0 %3827  ;;  %v3416_v63 = vpack.c.bf16 %v3825_v43, %v3824_v20 }
 0x926   : > { %3412 = vmatprep.subr.msk.bf16.mxu0 %vm4847_vm3, %v3410_v2  ;;  %v3830_v5 = vunpack.i.h.bf16 %v3828_v39  ;;  %v3829_v6 = vunpack.i.l.bf16 %v3828_v39  ;;  %v3833_v40 = vpop.permute.xlu1 %3832 }
 0x927   : > { %v3835_v41 = vunpack.i.h.bf16 %v3833_v40  ;;  %v3834_v51 = vunpack.i.l.bf16 %v3833_v40 }
 0x928   : > { %v3917_v14 = vpop.eup %3916  ;;  %v3422_v12 = vpack.c.bf16 %v3830_v5, %v3829_v6 }
 0x929   : > { %v3919_v19 = vpop.eup %3918  ;;  %v3838_v45 = vpop.permute.xlu0 %3837  ;;  %v1722_v53 = vmul.f32 %v3917_v14, %v3913_v1  ;;  %v3428_v52 = vpack.c.bf16 %v3835_v41, %v3834_v51 }
 0x92a   : > { %v1721_v34 = vmul.f32 %v3919_v19, %v3915_v4  ;;  %v3840_v55 = vunpack.i.h.bf16 %v3838_v45  ;;  %v3839_v56 = vunpack.i.l.bf16 %v3838_v45  ;;  %v3843_v49 = vpop.permute.xlu1 %3842 }
 0x92b   : > { %v3845_v58 = vunpack.i.h.bf16 %v3843_v49  ;;  %v3844_v59 = vunpack.i.l.bf16 %v3843_v49 }
 0x92c   : > { %3070 = vmatprep.mubr.f32.mxu0 %v1721_v34  ;;  %v3434_v48 = vpack.c.bf16 %v3840_v55, %v3839_v56 }
 0x92d   : > { %v3848_v0 = vpop.permute.xlu0 %3847  ;;  %3071 = vmatmul.mubr.f32.vlgmr.msra.gmra.mrb[22].mxu0 %v1722_v53  ;;  %v3440_v61 = vpack.c.bf16 %v3845_v58, %v3844_v59 }
 0x92e   : > { %3415 = vmatpush3.bf16.xpose.msk.msra.mxu0 %vm4847_vm3, %v3410_v2  ;;  %v3850_v62 = vunpack.i.h.bf16 %v3848_v0  ;;  %v3849_v1 = vunpack.i.l.bf16 %v3848_v0  ;;  %v3853_v4 = vpop.permute.xlu1 %3852 }
 0x92f   : > { %3418 = vmatprep.subr.msk.bf16.mxu0 %vm4847_vm3, %v3416_v63  ;;  %v3855_v7 = vunpack.i.h.bf16 %v3853_v4  ;;  %v3854_v9 = vunpack.i.l.bf16 %v3853_v4  ;;  %v2160_v4 = vld [vmem:[#allocation17 + $0x10] sm:$0xff] }
 0x930   : > { %v3446_v3 = vpack.c.bf16 %v3850_v62, %v3849_v1  ;;  %v2158_v62 = vld [vmem:[#allocation17] sm:$0xff]  ;;  %v2159_v1 = vld [vmem:[#allocation17 + $0x8] sm:$0xff] }
 0x931   : > { %v1858_v11 = vpop.permute.xlu0 %1857  ;;  %v3452_v10 = vpack.c.bf16 %v3855_v7, %v3854_v9  ;;  %v2161_v7 = vld [vmem:[#allocation17 + $0x18] sm:$0xff] }
 0x932   : > { %3105 = vmatprep.mubr.msk.f32.mxu0 %vm1018_vm2, %v1858_v11  ;;  %v1860_v13 = vpop.permute.xlu1 %1859  ;;  %v3494_v9 = vpack.c.bf16 %v2161_v7, %v2160_v4 }
 0x936   : > { %3421 = vmatpush3.bf16.xpose.msk.msra.mxu0 %vm4847_vm3, %v3416_v63 }
 0x937   : > { %3424 = vmatprep.subr.msk.bf16.mxu0 %vm4847_vm3, %v3422_v12 }
 0x93e   : > { %3427 = vmatpush3.bf16.xpose.msk.msra.mxu0 %vm4847_vm3, %v3422_v12 }
 0x93f   : > { %3430 = vmatprep.subr.msk.bf16.mxu0 %vm4847_vm3, %v3428_v52 }
 0x946   : > { %3433 = vmatpush3.bf16.xpose.msk.msra.mxu0 %vm4847_vm3, %v3428_v52 }
 0x947   : > { %3436 = vmatprep.subr.msk.bf16.mxu0 %vm4847_vm3, %v3434_v48 }
 0x94e   : > { %3439 = vmatpush3.bf16.xpose.msk.msra.mxu0 %vm4847_vm3, %v3434_v48 }
 0x94f   : > { %3442 = vmatprep.subr.msk.bf16.mxu0 %vm4847_vm3, %v3440_v61 }
 0x956   : > { %3445 = vmatpush3.bf16.xpose.msk.msra.mxu0 %vm4847_vm3, %v3440_v61 }
 0x957   : > { %3448 = vmatprep.subr.msk.bf16.mxu0 %vm4847_vm3, %v3446_v3 }
 0x95e   : > { %3451 = vmatpush3.bf16.xpose.msk.msra.mxu0 %vm4847_vm3, %v3446_v3  ;;  %v3490_v3 = vpack.c.bf16 %v2159_v1, %v2158_v62 }
 0x95f   : > { %3454 = vmatprep.subr.msk.bf16.mxu0 %vm4847_vm3, %v3452_v10 }
 0x966   : > { %3457 = vmatpush3.bf16.xpose.msk.msra.mxu0 %vm4847_vm3, %v3452_v10 }
 0x96d   : > { %3106 = vmatmul.mubr.msk.f32.vlgmr.msra.gmra.mrb[24].mxu0 %vm1018_vm2, %v1860_v13 }
 0xa00   : > { %v5195_v15 = vpop.f32.mrb[22].mxu0 }
 0xa01   : > { %v5197_v16 = vpop.f32.mrb[23].mxu0 }
 0xa40   : > { %v3107_v17 = vpop.f32.mrb[24].mxu0 }
 0xa41   : > { %v2001_v18 = vadd.f32 %v3107_v17, %v4937_v57  ;;  %v1995_v21 = vpop.f32.mrb[25].mxu0 }
 0xa42   : > { %v1996_v22 = vadd.f32 %v1995_v21, %v4937_v57  ;;  %v2593_v21 = vld [vmem:[#allocation18] ss:$0 sm:$0xff] }
 0xa43   : > { %2006 = vmax.xlane.f32.xlu1 %v2001_v18 }
 0xa44   : > { %2004 = vmax.xlane.f32.xlu0 %v1996_v22 }
 0xa54   : > { %3862 = vrot.lane.b32.xlu1 %v5019_v46, %s4335_s29 }
 0xa58   : > { %3872 = vrot.lane.b32.xlu1 %v5055_v25, %s4335_s29 }
 0xa5a   : > { %3857 = vrot.lane.b32.xlu0 %v5031_v50, %s4335_s29 }
 0xa5c   : > { %3882 = vrot.lane.b32.xlu1 %v5025_v47, %s4335_s29 }
 0xa5e   : > { %3867 = vrot.lane.b32.xlu0 %v5043_v29, %s4335_s29 }
 0xa62   : > { %3877 = vrot.lane.b32.xlu0 %v5061_v32, %s4335_s29 }
 0xad0   : > { %v2007_v35 = vpop.xlane.xlu1 %2006 }
 0xad1   : > { %v2009_v57 = vsub.f32 %v2001_v18, %v2007_v35  ;;  %v2005_v24 = vpop.xlane.xlu0 %2004 }
 0xad2   : > { %v2008_v26 = vsub.f32 %v1996_v22, %v2005_v24 }
 0xad3   : > { %v2012_v46 = vmul.f32 1.442695, %v2009_v57 }
 0xad4   : > { %v2010_v28 = vmul.f32 1.442695, %v2008_v26  ;;  %v3863_v30 = vpop.permute.xlu1 %3862 }
 0xad5   : > { %3920 = vpow2.f32 %v2012_v46  ;;  %v3865_v25 = vunpack.i.h.bf16 %v3863_v30  ;;  %v3858_v36 = vpop.permute.xlu0 %3857  ;;  %v3864_v50 = vunpack.i.l.bf16 %v3863_v30 }
 0xad6   : > { %3922 = vpow2.f32 %v2010_v28  ;;  %v3860_v37 = vunpack.i.h.bf16 %v3858_v36  ;;  %v3859_v47 = vunpack.i.l.bf16 %v3858_v36 }
 0xad7   : > { %v3462_v29 = vpack.c.bf16 %v3865_v25, %v3864_v50 }
 0xad8   : > { %v3458_v38 = vpack.c.bf16 %v3860_v37, %v3859_v47  ;;  %v3873_v32 = vpop.permute.xlu1 %3872 }
 0xad9   : > { %v3868_v44 = vpop.permute.xlu0 %3867  ;;  %v3875_v8 = vunpack.i.h.bf16 %v3873_v32  ;;  %v3874_v2 = vunpack.i.l.bf16 %v3873_v32 }
 0xada   : > { %v3870_v54 = vunpack.i.h.bf16 %v3868_v44  ;;  %v3869_v60 = vunpack.i.l.bf16 %v3868_v44  ;;  %3459 = vmatprep.subr.bf16.mxu1 %v3458_v38 }
 0xadb   : > { %3461 = vmatpush3.bf16.msra.mxu1 %v3458_v38  ;;  %v3470_v43 = vpack.c.bf16 %v3875_v8, %v3874_v2 }
 0xadc   : > { %3463 = vmatprep.subr.bf16.mxu1 %v3462_v29  ;;  %v3466_v39 = vpack.c.bf16 %v3870_v54, %v3869_v60  ;;  %v3883_v34 = vpop.permute.xlu1 %3882 }
 0xadd   : > { %v3878_v14 = vpop.permute.xlu0 %3877  ;;  %v3885_v53 = vunpack.i.h.bf16 %v3883_v34  ;;  %v3884_v63 = vunpack.i.l.bf16 %v3883_v34 }
 0xade   : > { %v3880_v20 = vunpack.i.h.bf16 %v3878_v14  ;;  %v3879_v45 = vunpack.i.l.bf16 %v3878_v14 }
 0xadf   : > { %v3921_v42 = vpop.eup %3920  ;;  %3465 = vmatpush3.bf16.msra.mxu1 %v3462_v29  ;;  %v3478_v5 = vpack.c.bf16 %v3885_v53, %v3884_v63 }
 0xae0   : > { %v3923_v19 = vpop.eup %3922  ;;  %2016 = vadd.xlane.f32.xlu1 %v3921_v42  ;;  %3467 = vmatprep.subr.bf16.mxu1 %v3466_v39  ;;  %v3474_v0 = vpack.c.bf16 %v3880_v20, %v3879_v45 }
 0xae1   : > { %2014 = vadd.xlane.f32.xlu0 %v3923_v19 }
 0xae3   : > { %3469 = vmatpush3.bf16.msra.mxu1 %v3466_v39 }
 0xae4   : > { %3471 = vmatprep.subr.bf16.mxu1 %v3470_v43 }
 0xae7   : > { %3473 = vmatpush3.bf16.msra.mxu1 %v3470_v43 }
 0xae8   : > { %3475 = vmatprep.subr.bf16.mxu1 %v3474_v0 }
 0xaeb   : > { %3477 = vmatpush3.bf16.msra.mxu1 %v3474_v0 }
 0xaec   : > { %3479 = vmatprep.subr.bf16.mxu1 %v3478_v5 }
 0xaef   : > { %3481 = vmatpush3.bf16.msra.mxu1 %v3478_v5 }
 0xaf1   : > { %3892 = vrot.lane.b32.xlu1 %v5049_v23, %s4335_s29 }
 0xaf5   : > { %1551 = vrot.lane.b32.xlu1 %v5119_v31, %s4336_s24 }
 0xaf7   : > { %3887 = vrot.lane.b32.xlu0 %v5037_v27, %s4335_s29 }
 0xaf9   : > { %1850 = vrot.lane.b32.xlu1 %v5195_v15, %s4337_s23 }
 0xafb   : > { %1549 = vrot.lane.b32.xlu0 %v5121_v33, %s4336_s24 }
 0xaff   : > { %1848 = vrot.lane.b32.xlu0 %v5197_v16, %s4337_s23 }
 0xb6d   : > { %v2017_v6 = vpop.xlane.xlu1 %2016 }
 0xb6e   : > { %v2015_v11 = vpop.xlane.xlu0 %2014 }
 0xb6f   : > { %3924 = vrcp.f32 %v2015_v11 }
 0xb70   : > { %3926 = vrcp.f32 %v2017_v6 }
 0xb71   : > { %v3893_v23 = vpop.permute.xlu1 %3892 }
 0xb72   : > { %v3888_v12 = vpop.permute.xlu0 %3887  ;;  %v3895_v40 = vunpack.i.h.bf16 %v3893_v23  ;;  %v3894_v31 = vunpack.i.l.bf16 %v3893_v23 }
 0xb73   : > { %v3890_v41 = vunpack.i.h.bf16 %v3888_v12  ;;  %v3889_v51 = vunpack.i.l.bf16 %v3888_v12 }
 0xb74   : > { %v3486_v56 = vpack.c.bf16 %v3895_v40, %v3894_v31 }
 0xb75   : > { %v3482_v27 = vpack.c.bf16 %v3890_v41, %v3889_v51  ;;  %v1552_v52 = vpop.permute.xlu1 %1551 }
 0xb76   : > { %1557 = vst.msk [vmem:[#allocation2 + $0x8] sm:$0xff] %vm1555_vm5, %v1552_v52  ;;  %v1550_v55 = vpop.permute.xlu0 %1549 }
 0xb77   : > { %1556 = vst.msk [vmem:[#allocation2] sm:$0xff] %vm1555_vm5, %v1550_v55  ;;  %3483 = vmatprep.subr.bf16.mxu1 %v3482_v27 }
 0xb78   : > { %3485 = vmatpush3.bf16.msra.mxu1 %v3482_v27 }
 0xb79   : > { %v3925_v33 = vpop.eup %3924  ;;  %v1851_v48 = vpop.permute.xlu1 %1850  ;;  %3487 = vmatprep.subr.bf16.mxu1 %v3486_v56 }
 0xb7a   : > { %v3927_v49 = vpop.eup %3926  ;;  %1856 = vst.msk [vmem:[#allocation2 + $0x8] sm:$0xff] %vm1854_vm6, %v1851_v48  ;;  %v1849_v58 = vpop.permute.xlu0 %1848  ;;  %v2020_v59 = vmul.f32 %v3925_v33, %v3923_v19 }
 0xb7b   : > { %1855 = vst.msk [vmem:[#allocation2] sm:$0xff] %vm1854_vm6, %v1849_v58  ;;  %v2021_v61 = vmul.f32 %v3927_v49, %v3921_v42 }
 0xb7c   : > { %3489 = vmatpush3.bf16.msra.mxu1 %v3486_v56  ;;  %3140 = vmatprep.mubr.f32.mxu1 %v2020_v59 }
 0xb7d   : > { %3491 = vmatprep.subr.bf16.mxu1 %v3490_v3 }
 0xb7f   : > { %3141 = vmatmul.mubr.f32.vlgmr.msra.gmra.mrb[22].mxu1 %v2021_v61 }
 0xb80   : > { %3493 = vmatpush3.bf16.msra.mxu1 %v3490_v3 }
 0xb81   : > { %3495 = vmatprep.subr.bf16.mxu1 %v3494_v9 }
 0xb84   : > { %3497 = vmatpush3.bf16.msra.mxu1 %v3494_v9 }
 0xc52   : > { %v3142_v10 = vpop.f32.mrb[22].mxu1 }
 0xc53   : > { %2149 = vrot.lane.b32.xlu1 %v3142_v10, %s4338_s21  ;;  %v2136_v13 = vpop.f32.mrb[23].mxu1 }
 0xc54   : > { %2147 = vrot.lane.b32.xlu0 %v2136_v13, %s4338_s21 }
 0xcc5   : > { %v2150_v15 = vpop.permute.xlu1 %2149 }
 0xcc6   : > { %2155 = vst.msk [vmem:[#allocation2 + $0x8] sm:$0xff] %vm2153_vm7, %v2150_v15  ;;  %v2148_v16 = vpop.permute.xlu0 %2147 }
 0xcc7   : > { %2154 = vst.msk [vmem:[#allocation2] sm:$0xff] %vm2153_vm7, %v2148_v16 }
 0xccd   : > { %v2157_v18 = vld [vmem:[#allocation2 + $0x8] sm:$0xff] }
 0xcce   : > { %v2156_v17 = vld [vmem:[#allocation2] sm:$0xff] }
 0xccf   : > { %3151 = vmatprep.mubr.msk.f32.mxu1 %vm575_vm1, %v2156_v17 }
 0xcd0   : > { %3152 = vmatmul.mubr.msk.f32.vlgmr.msra.gmra.mrb[24].mxu1 %vm575_vm1, %v2157_v18 }
 0xda3   : > { %v3153_v22 = vpop.f32.mrb[24].mxu1 }
 0xda4   : > { %v2247_v35 = vadd.f32 %v3153_v22, %v2593_v21  ;;  %v2241_v57 = vpop.f32.mrb[25].mxu1 }
 0xda5   : > { %v2242_v24 = vadd.f32 %v2593_v21, %v2241_v57 }
 0xda6   : > { %2251 = vst.msk [vmem:[%s543_s5 + $0x8] sm:$0xff] %vm575_vm1, %v2247_v35 }
 0xda7   : > { %2250 = vst.msk [vmem:[%s543_s5] sm:$0xff] %vm575_vm1, %v2242_v24 }
 0xda8   : > { %4225 = shalt.err (!%p4222_p3)
}
 0xda9   : > { %s4226_s26 = scalar_lea.hbm %s5233_s4, 256  ;;  %s4230_s21 = scalar_lea.hbm %s5352_s20, 512 }
 0xdaa   : > { %p4227_p11 = scmp.ne.s32.totalorder %s5233_s4, %s4226_s26  ;;  %p4231_p13 = scmp.lt.u32.totalorder %s5233_s4, %s5352_s20 }
 0xdab   : > { %p4232_p4 = scmp.lt.u32.totalorder %s4230_s21, %s4226_s26  ;;  %p4234_p0 = scmp.lt.u32.totalorder %s4226_s26, %s5233_s4 }
 0xdac   : > { %p4228_p6 = pnand %p4227_p11, %p5353_p7 }
 0xdad   : > { %p4233_p9 = por %p4232_p4, %p4231_p13 }
 0xdae   : > { %p4229_p2 = pneg %p4228_p6 }
 0xdaf   : > { %p4235_p5 = por %p4234_p0, %p4233_p9 }
 0xdb1   : > { %p4236_p1 = pnand %p4235_p5, %p4229_p2 }
 0xdb3   : > { %4239 = shalt.err (!%p4236_p1)
}
 0xdb4   : > { %s4340_s30 = smov 128  }
 0xdb5   : > { %3534 = dma.vmem_to_hbm [thread:$0]  (%p5353_p7), %s5228_s28, 256, %s5233_s4, %s2253_s3, %s4340_s30, %s4340_s30, %s4336_s24  }
 0xdb6 PF: > { %s2283_s7 = sand.u32 1, %s4298_s13   ;;  %p5354_p10 = scmp.ne.s32.totalorder %s5331_s25, 0 }
 0xdb7   : > { %p5355_p12 = scmp.ge.s32.totalorder %s4318_s18, 2  ;;  %s2284_s1 = scalar_lea.sflag [#allocation5], %s2283_s7 }
 0xdb9   : > { %p3569_p8 = pnand %p5355_p12, %p5354_p10 }
 0xdbb   : > { %4293 = dma.done.wait (!%p3569_p8), %s2284_s1, 256  }
 0xdbc   : > { %4295 = vsyncadd (!%p3569_p8), %s2284_s1, 4294967040  ;;  %s33_s18 = sadd.s32 1, %s4318_s18   ;;  %s5356_s13 = smov %s4302_s14 }
 0xdbd   : > { %p30_p3 = scmp.ge.s32.totalorder %s33_s18, 4   ;;  %s5357_s14 = smov %s4306_s15 }
 0xdbe   : > { %s5358_s15 = smov %s4653_s10  ;;  %s5359_s16 = smov %s4314_s17 }
 0xdbf   : > { %s5360_s17 = smov %s5362_s2  ;;  %32 = sbr.rel (!%p30_p3) target bundleno = 22 (0x16), region = 150 }
 0xdc6   :  { %2289 = vsyncpa [#allocation4], 1 }
 0xdc7   :  { %2291 = vsyncpa [#allocation4 + $0x1], 1 }
 0xdc8   :  { %2292 = vsyncpa [#allocation7], 1 }
 0xdc9   :  { %2294 = vsyncpa [#allocation7 + $0x1], 1 }
 0xdca   :  { %2295 = vsyncpa [#allocation10], 1 }
 0xdcb   :  { %2296 = vsyncpa [#allocation13], 1 }
 0xdcc   :  { %2297 = vsyncpa [#allocation16], 1 }
 0xdcd   :  { %2298 = vsyncpa [#allocation19], 1 }
 0xdce   :  { %2299 = vsyncpa [#allocation5], 1 }
 0xdcf   :  { %2301 = vsyncpa [#allocation5 + $0x1], 1 }

</bundles_post_ra>
